<compile_context>
chip_gen: v5e
topology: v5e:2x2
jax: 0.10.0
libtpu: 0.0.40
codegen_flags: <defaults>
</compile_context>

<pallas_src>
import functools

import jax
import jax.numpy as jnp
from jax.experimental import pallas as pl
from jax.experimental.pallas import tpu as pltpu


# ----------------------------------------------------------------------------
# Fused DecoderLayer kernel (grid over batch tiles)
# ----------------------------------------------------------------------------
def decoder_layer_kernel(embp_ref, qx_ref, qy_ref, cw_ref, cb_ref, fw_ref,
                         qx_out_ref, res_out_ref, pad_ref, *,
                         kernel_size, dilation, left_pad, neg_slope=0.01):
    TB, q, d = qx_ref.shape
    total = dilation * (kernel_size - 1)
    left = total // 2
    right = total - left

    # pad_ref: (TB, left_pad + q + right, d) bf16 persistent scratch.
    # The halo is never written after this, so zero it only on the first step.
    if left_pad > 0 or right > 0:
        @pl.when(pl.program_id(0) == 0)
        def _init_halo():
            if left_pad > 0:
                pad_ref[:, :left_pad, :] = jnp.zeros((TB, left_pad, d), jnp.bfloat16)
            if right > 0:
                pad_ref[:, left_pad + q:, :] = jnp.zeros((TB, right, d), jnp.bfloat16)

    def leaky(y):
        return jnp.where(y >= 0, y, neg_slope * y)

    def conv1d_same(x_bf16, idx):
        # x_bf16: (TB, q, d) bf16 channels-last; tap weight cw_ref[idx, k]: (d_in, d_out) bf16.
        # Interior write starts at left_pad (multiple of 8 sublanes -> unmasked store).
        pad_ref[:, left_pad:left_pad + q, :] = x_bf16
        base = left_pad - left
        acc = None
        for k in range(kernel_size):
            off = base + k * dilation
            tap = pad_ref[:, off:off + q, :]                      # (TB, q, d) bf16, no reshape
            contrib = jnp.einsum('bqd,de->bqe', tap, cw_ref[idx, k, :, :],
                                 preferred_element_type=jnp.float32)
            acc = contrib if acc is None else acc + contrib
        return acc + cb_ref[idx]                                  # bias broadcast (d,)

    def conv_block(x_f32, base):
        h = leaky(conv1d_same(x_f32.astype(jnp.bfloat16), base))         # conv1 + LeakyReLU
        h = leaky(conv1d_same(h.astype(jnp.bfloat16), base + 1))         # conv2 + LeakyReLU
        return h + x_f32                                                  # residual (upordownsample=None)

    qx = qx_ref[...].astype(jnp.float32)        # (TB, q, d)
    qy = qy_ref[...].astype(jnp.float32)

    qx_conv = conv_block(qx, 0)                 # (TB, q, d) f32 == query_x_input
    qy_conv = conv_block(qy, 2)                 # (TB, q, d) f32 == query_y_input

    # fc(cat([emb, qx_in, qy_in], -1)) == (emb@We + b) + qx_in@Wx + qy_in@Wy
    # (emb@We + b) is precomputed in the wrapper -> embp_ref (TB, 1, d).
    x_proj = jnp.einsum('bqd,de->bqe', qx_conv.astype(jnp.bfloat16), fw_ref[0],
                        preferred_element_type=jnp.float32)
    y_proj = jnp.einsum('bqd,de->bqe', qy_conv.astype(jnp.bfloat16), fw_ref[1],
                        preferred_element_type=jnp.float32)

    res = x_proj + y_proj + embp_ref[...] + qy              # + query_y residual

    qx_out_ref[...] = qx_conv.astype(qx_out_ref.dtype)
    res_out_ref[...] = res.astype(res_out_ref.dtype)


# ----------------------------------------------------------------------------
# Wrapper
# ----------------------------------------------------------------------------
def _vmem_footprint(tb, q, d, kernel_size, pad_rows):
    io = (4 * tb * q * d + tb * d) * 4 * 2            # qx, qy, 2 outs, emb_proj: f32, double-buffered
    pad = tb * pad_rows * d * 2                       # bf16 halo scratch (single buffer)
    wts = (4 * kernel_size + 2) * d * d * 2 * 2       # bf16 weights, double-buffered
    bias = 4 * d * 4 * 2
    return io + pad + wts + bias


def _pick_tb(b, q, d, kernel_size, pad_extra, target_rows=256,
             vmem_budget=40 << 20):
    """Batch-tile size: enough rows/step (~256) to feed the MXU.  No 'grid >= 2'
    cap — v5e/v6e have a single TC and tiny steps only add per-step overhead;
    on v7x splitting tiny steps across the 2 TCs saves nothing.  Bounded by a
    conservative VMEM estimate (valid against v7x's 64 MiB per-TC VMEM)."""
    tb = max(1, min(b, max(1, target_rows // max(q, 1))))
    while b % tb:
        tb -= 1
    while tb > 1 and _vmem_footprint(tb, q, d, kernel_size, q + pad_extra) > vmem_budget:
        tb -= 1
        while b % tb:
            tb -= 1
    return tb


def decoder_layer(emb, query_x, query_y, params, *, kernel_size, dilation):
    """emb: (b, d); query_x/query_y: (b, q, d). Returns (query_x_input, res + query_y)."""
    b, q, d = query_y.shape
    total = dilation * (kernel_size - 1)
    left = total // 2
    right = total - left
    left_pad = ((left + 7) // 8) * 8 if left > 0 else 0   # 8-sublane-aligned interior store
    pad_rows = left_pad + q + right

    TB = _pick_tb(b, q, d, kernel_size, pad_rows - q)

    cw, cb = params["conv_w"], params["conv_b"]
    fw_xy = params["fc_w_xy"]

    # Hoist the emb segment of the fc: one (b,d)@(d,d) XLA matmul, bias folded in.
    emb_proj = (jnp.dot(emb.astype(jnp.float32), params["fc_w_emb"])
                + params["fc_b"]).reshape(b, 1, d)

    def batch_spec(shape):
        return pl.BlockSpec(shape, lambda i: (i,) + (0,) * (len(shape) - 1))

    def const_spec(arr):
        return pl.BlockSpec(arr.shape, lambda i: (0,) * arr.ndim)

    kernel = functools.partial(decoder_layer_kernel,
                               kernel_size=kernel_size, dilation=dilation,
                               left_pad=left_pad)

    est = _vmem_footprint(TB, q, d, kernel_size, pad_rows)
    vmem_limit = int(min(max(est * 5 // 4, 32 << 20), 64 << 20))

    qx_out, res_out = pl.pallas_call(
        kernel,
        out_shape=(jax.ShapeDtypeStruct((b, q, d), query_x.dtype),
                   jax.ShapeDtypeStruct((b, q, d), query_y.dtype)),
        grid_spec=pltpu.PrefetchScalarGridSpec(
            num_scalar_prefetch=0,
            grid=(b // TB,),
            in_specs=[
                batch_spec((TB, 1, d)),      # emb_proj (emb@We + fc bias)
                batch_spec((TB, q, d)),      # query_x
                batch_spec((TB, q, d)),      # query_y
                const_spec(cw), const_spec(cb), const_spec(fw_xy),
            ],
            out_specs=[
                batch_spec((TB, q, d)),      # query_x_input
                batch_spec((TB, q, d)),      # res + query_y
            ],
            scratch_shapes=[pltpu.VMEM((TB, pad_rows, d), jnp.bfloat16)],
        ),
        # "arbitrary": grid is a sequential loop, so the once-only halo init of the
        # persistent scratch is valid on every generation (incl. v7x megacore).
        compiler_params=pltpu.CompilerParams(
            dimension_semantics=("arbitrary",),
            vmem_limit_bytes=vmem_limit),
    )(emb_proj, query_x, query_y, cw, cb, fw_xy)
    return qx_out, res_out


# ----------------------------------------------------------------------------
# Parameter init (shapes follow the PyTorch module; weight_norm == identity at init)
# ----------------------------------------------------------------------------
def init_params(key, d_model, kernel_size):
    ks = jax.random.split(key, 10)
    sd = 0.05

    def conv_w(k):  # PyTorch Conv1d weight (out, in, K) -> per-tap (K, in, out)
        w = jax.random.normal(k, (d_model, d_model, kernel_size), jnp.float32) * sd
        return jnp.transpose(w, (2, 1, 0))

    cwx1, cwx2, cwy1, cwy2 = (conv_w(ks[0]), conv_w(ks[1]),
                              conv_w(ks[2]), conv_w(ks[3]))
    cbx1 = jax.random.normal(ks[4], (d_model,), jnp.float32) * sd
    cbx2 = jax.random.normal(ks[5], (d_model,), jnp.float32) * sd
    cby1 = jax.random.normal(ks[6], (d_model,), jnp.float32) * sd
    cby2 = jax.random.normal(ks[7], (d_model,), jnp.float32) * sd

    # nn.Linear(3*d, d): weight (d, 3d), bias (d,).  Split by cat segment
    # [emb | query_x_in | query_y_in] and transpose so the kernel never concatenates.
    wfc = jax.random.normal(ks[8], (d_model, 3 * d_model), jnp.float32) * sd
    bfc = jax.random.normal(ks[9], (d_model,), jnp.float32) * sd

    return {
        # bf16 MXU operands (accumulation stays f32 in the kernel)
        "conv_w": jnp.stack([cwx1, cwx2, cwy1, cwy2]).astype(jnp.bfloat16),  # (4, K, d, d)
        "conv_b": jnp.stack([cbx1, cbx2, cby1, cby2]),                       # (4, d) f32
        "fc_w_xy": jnp.stack([wfc[:, d_model:2 * d_model].T,
                              wfc[:, 2 * d_model:].T]).astype(jnp.bfloat16),  # (2, d, d)
        "fc_w_emb": wfc[:, :d_model].T,                                      # (d, d) f32 (wrapper)
        "fc_b": bfc,                                                         # (d,) f32 (wrapper)
    }


# ----------------------------------------------------------------------------
# Pure-JAX reference (same pre-transformed params) for a numerical sanity check
# ----------------------------------------------------------------------------
def _decoder_layer_ref(emb, query_x, query_y, params, *, kernel_size, dilation):
    cw = params["conv_w"].astype(jnp.float32)
    cb = params["conv_b"]
    fw_xy = params["fc_w_xy"].astype(jnp.float32)
    fw_emb, fb = params["fc_w_emb"], params["fc_b"]
    total = dilation * (kernel_size - 1)
    left = total // 2
    right = total - left

    def leaky(y):
        return jnp.where(y >= 0, y, 0.01 * y)

    def conv(x, w, bvec):
        L = x.shape[1]
        xp = jnp.pad(x, ((0, 0), (left, right), (0, 0)))
        acc = sum(jnp.einsum('blc,cd->bld',
                             xp[:, k * dilation:k * dilation + L, :], w[k])
                  for k in range(kernel_size))
        return acc + bvec

    def conv_block(x, base):
        h = leaky(conv(x, cw[base], cb[base]))
        h = leaky(conv(h, cw[base + 1], cb[base + 1]))
        return h + x

    qx_in = conv_block(query_x, 0)
    qy_in = conv_block(query_y, 2)
    res = ((jnp.einsum('bd,de->be', emb, fw_emb) + fb)[:, None, :]
           + jnp.einsum('bqd,de->bqe', qx_in, fw_xy[0])
           + jnp.einsum('bqd,de->bqe', qy_in, fw_xy[1]))
    return qx_in, res + query_y


if __name__ == "__main__":
    # small shapes consistent with forward(): emb (b, d), query_x/y (b, q, d)
    b, q, d_model = 4, 16, 128      # d_model=128 keeps every lane dim 128-aligned
    kernel_size, dilation = 3, 2

    key = jax.random.PRNGKey(0)
    k_emb, k_qx, k_qy, k_p = jax.random.split(key, 4)
    emb = jax.random.normal(k_emb, (b, d_model), jnp.float32)
    query_x = jax.random.normal(k_qx, (b, q, d_model), jnp.float32)
    query_y = jax.random.normal(k_qy, (b, q, d_model), jnp.float32)
    params = init_params(k_p, d_model, kernel_size)

    fwd = jax.jit(functools.partial(decoder_layer,
                                    kernel_size=kernel_size, dilation=dilation))
    qx_in, out = fwd(emb, query_x, query_y, params)
    qx_in, out = jax.block_until_ready((qx_in, out))

    assert qx_in.shape == (b, q, d_model) and out.shape == (b, q, d_model)
    assert bool(jnp.all(jnp.isfinite(qx_in))) and bool(jnp.all(jnp.isfinite(out)))

    # numerical check against a pure-JAX reference (bf16 MXU operands in the
    # kernel vs f32 reference -> loosened tolerance)
    qx_ref, out_ref = _decoder_layer_ref(emb, query_x, query_y, params,
                                         kernel_size=kernel_size, dilation=dilation)
    assert bool(jnp.allclose(qx_in, qx_ref, atol=4e-2, rtol=4e-2))
    assert bool(jnp.allclose(out, out_ref, atol=4e-2, rtol=4e-2))
    print("KERNEL_OK")
</pallas_src>

<mosaic_0001>
module attributes {stable_mosaic.version = 11 : i64} {
  func.func @decoder_layer_kernel(%arg0: i32, %arg1: memref<4x1x128xf32, #tpu.memory_space<vmem>>, %arg2: memref<4x16x128xf32, #tpu.memory_space<vmem>>, %arg3: memref<4x16x128xf32, #tpu.memory_space<vmem>>, %arg4: memref<4x3x128x128xbf16, #tpu.memory_space<vmem>>, %arg5: memref<4x128xf32, #tpu.memory_space<vmem>>, %arg6: memref<2x128x128xbf16, #tpu.memory_space<vmem>>, %arg7: memref<4x16x128xf32, #tpu.memory_space<vmem>>, %arg8: memref<4x16x128xf32, #tpu.memory_space<vmem>>, %arg9: memref<4x26x128xbf16, #tpu.memory_space<vmem>>) attributes {dimension_semantics = [#tpu.dimension_semantics<arbitrary>], iteration_bounds = array<i64: 1>, scalar_prefetch = 0 : i64, scratch_operands = 1 : i64, tpu.core_type = #tpu.core_type<tc>, window_params = [{transform_indices = @transform_0, window_bounds = array<i64: 4, 1, 128>}, {transform_indices = @transform_1, window_bounds = array<i64: 4, 16, 128>}, {transform_indices = @transform_2, window_bounds = array<i64: 4, 16, 128>}, {pipeline_mode = #tpu.pipeline_mode<synchronous>, transform_indices = @transform_3, window_bounds = array<i64: 4, 3, 128, 128>}, {pipeline_mode = #tpu.pipeline_mode<synchronous>, transform_indices = @transform_4, window_bounds = array<i64: 4, 128>}, {pipeline_mode = #tpu.pipeline_mode<synchronous>, transform_indices = @transform_5, window_bounds = array<i64: 2, 128, 128>}, {transform_indices = @transform_6, window_bounds = array<i64: 4, 16, 128>}, {transform_indices = @transform_7, window_bounds = array<i64: 4, 16, 128>}]} {
    %c0_i32 = arith.constant 0 : i32
    %0 = arith.cmpi eq, %arg0, %c0_i32 : i32
    %1 = arith.extui %0 : i1 to i32
    %c0_i32_0 = arith.constant 0 : i32
    %2 = arith.cmpi ne, %1, %c0_i32_0 : i32
    scf.if %2 {
      %cst_140 = arith.constant 0.000000e+00 : bf16
      %126 = vector.broadcast %cst_140 : bf16 to vector<4x8x128xbf16>
      %c0_141 = arith.constant 0 : index
      %c0_142 = arith.constant 0 : index
      %c0_143 = arith.constant 0 : index
      %127 = vector.load %arg9[%c0_141, %c0_142, %c0_143] : memref<4x26x128xbf16, #tpu.memory_space<vmem>>, vector<4x8x128xbf16>
      tpu.vector_store %arg9[%c0_141, %c0_142, %c0_143], %126 {strides = array<i32>} : memref<4x26x128xbf16, #tpu.memory_space<vmem>>, vector<4x8x128xbf16>,
      %cst_144 = arith.constant 0.000000e+00 : bf16
      %128 = vector.broadcast %cst_144 : bf16 to vector<4x2x128xbf16>
      %c0_145 = arith.constant 0 : index
      %c24 = arith.constant 24 : index
      %c0_146 = arith.constant 0 : index
      %129 = vector.load %arg9[%c0_145, %c24, %c0_146] : memref<4x26x128xbf16, #tpu.memory_space<vmem>>, vector<4x2x128xbf16>
      tpu.vector_store %arg9[%c0_145, %c24, %c0_146], %128 {strides = array<i32>} : memref<4x26x128xbf16, #tpu.memory_space<vmem>>, vector<4x2x128xbf16>,
    } else {
    }
    %c0 = arith.constant 0 : index
    %c0_1 = arith.constant 0 : index
    %c0_2 = arith.constant 0 : index
    %3 = vector.load %arg2[%c0, %c0_1, %c0_2] : memref<4x16x128xf32, #tpu.memory_space<vmem>>, vector<4x16x128xf32>
    %c0_3 = arith.constant 0 : index
    %c0_4 = arith.constant 0 : index
    %c0_5 = arith.constant 0 : index
    %4 = vector.load %arg3[%c0_3, %c0_4, %c0_5] : memref<4x16x128xf32, #tpu.memory_space<vmem>>, vector<4x16x128xf32>
    %5 = arith.truncf %3 : vector<4x16x128xf32> to vector<4x16x128xbf16>
    %c0_6 = arith.constant 0 : index
    %c8 = arith.constant 8 : index
    %c0_7 = arith.constant 0 : index
    %6 = vector.load %arg9[%c0_6, %c8, %c0_7] : memref<4x26x128xbf16, #tpu.memory_space<vmem>>, vector<4x16x128xbf16>
    tpu.vector_store %arg9[%c0_6, %c8, %c0_7], %5 {strides = array<i32>} : memref<4x26x128xbf16, #tpu.memory_space<vmem>>, vector<4x16x128xbf16>,
    %c0_8 = arith.constant 0 : index
    %c6 = arith.constant 6 : index
    %c0_9 = arith.constant 0 : index
    %7 = vector.load %arg9[%c0_8, %c6, %c0_9] : memref<4x26x128xbf16, #tpu.memory_space<vmem>>, vector<4x16x128xbf16>
    %c0_10 = arith.constant 0 : index
    %c0_11 = arith.constant 0 : index
    %c0_12 = arith.constant 0 : index
    %c0_13 = arith.constant 0 : index
    %8 = vector.load %arg4[%c0_10, %c0_11, %c0_12, %c0_13] : memref<4x3x128x128xbf16, #tpu.memory_space<vmem>>, vector<1x1x128x128xbf16>
    %9 = vector.shape_cast %8 : vector<1x1x128x128xbf16> to vector<128x128xbf16>
    "tpu.trace_start"() <{level = 10 : i32, message = "bqd,de->bqe"}> : () -> ()
    %cst = arith.constant dense<0.000000e+00> : vector<4x16x128xf32>
    %10 = tpu.matmul %7, %9, %cst {dimension_numbers = #tpu.dot_dimension_numbers<[2], [0], [0, 1], [1], [0, 0, 0, 1, 1, 1], [], []>} : vector<4x16x128xbf16>, vector<128x128xbf16>, vector<4x16x128xf32> -> vector<4x16x128xf32>
    "tpu.trace_stop"() : () -> ()
    %c0_14 = arith.constant 0 : index
    %c8_15 = arith.constant 8 : index
    %c0_16 = arith.constant 0 : index
    %11 = vector.load %arg9[%c0_14, %c8_15, %c0_16] : memref<4x26x128xbf16, #tpu.memory_space<vmem>>, vector<4x16x128xbf16>
    %c0_17 = arith.constant 0 : index
    %c1 = arith.constant 1 : index
    %c0_18 = arith.constant 0 : index
    %c0_19 = arith.constant 0 : index
    %12 = vector.load %arg4[%c0_17, %c1, %c0_18, %c0_19] : memref<4x3x128x128xbf16, #tpu.memory_space<vmem>>, vector<1x1x128x128xbf16>
    %13 = vector.shape_cast %12 : vector<1x1x128x128xbf16> to vector<128x128xbf16>
    "tpu.trace_start"() <{level = 10 : i32, message = "bqd,de->bqe"}> : () -> ()
    %cst_20 = arith.constant dense<0.000000e+00> : vector<4x16x128xf32>
    %14 = tpu.matmul %11, %13, %cst_20 {dimension_numbers = #tpu.dot_dimension_numbers<[2], [0], [0, 1], [1], [0, 0, 0, 1, 1, 1], [], []>} : vector<4x16x128xbf16>, vector<128x128xbf16>, vector<4x16x128xf32> -> vector<4x16x128xf32>
    "tpu.trace_stop"() : () -> ()
    %15 = arith.addf %10, %14 : vector<4x16x128xf32>
    %c0_21 = arith.constant 0 : index
    %c10 = arith.constant 10 : index
    %c0_22 = arith.constant 0 : index
    %16 = vector.load %arg9[%c0_21, %c10, %c0_22] : memref<4x26x128xbf16, #tpu.memory_space<vmem>>, vector<4x16x128xbf16>
    %c0_23 = arith.constant 0 : index
    %c2 = arith.constant 2 : index
    %c0_24 = arith.constant 0 : index
    %c0_25 = arith.constant 0 : index
    %17 = vector.load %arg4[%c0_23, %c2, %c0_24, %c0_25] : memref<4x3x128x128xbf16, #tpu.memory_space<vmem>>, vector<1x1x128x128xbf16>
    %18 = vector.shape_cast %17 : vector<1x1x128x128xbf16> to vector<128x128xbf16>
    "tpu.trace_start"() <{level = 10 : i32, message = "bqd,de->bqe"}> : () -> ()
    %cst_26 = arith.constant dense<0.000000e+00> : vector<4x16x128xf32>
    %19 = tpu.matmul %16, %18, %cst_26 {dimension_numbers = #tpu.dot_dimension_numbers<[2], [0], [0, 1], [1], [0, 0, 0, 1, 1, 1], [], []>} : vector<4x16x128xbf16>, vector<128x128xbf16>, vector<4x16x128xf32> -> vector<4x16x128xf32>
    "tpu.trace_stop"() : () -> ()
    %20 = arith.addf %15, %19 : vector<4x16x128xf32>
    %c0_27 = arith.constant 0 : index
    %c0_28 = arith.constant 0 : index
    %21 = vector.load %arg5[%c0_27, %c0_28] : memref<4x128xf32, #tpu.memory_space<vmem>>, vector<1x128xf32>
    %22 = vector.shape_cast %21 : vector<1x128xf32> to vector<128xf32>
    %23 = vector.shape_cast %22 : vector<128xf32> to vector<1x1x128xf32>
    %24 = vector.broadcast %23 : vector<1x1x128xf32> to vector<4x16x128xf32>
    %25 = arith.addf %20, %24 : vector<4x16x128xf32>
    %cst_29 = arith.constant 0.000000e+00 : f32
    %26 = vector.broadcast %cst_29 : f32 to vector<4x16x128xf32>
    %27 = arith.cmpf oge, %25, %26 : vector<4x16x128xf32>
    %cst_30 = arith.constant 0.00999999977 : f32
    %28 = vector.broadcast %cst_30 : f32 to vector<4x16x128xf32>
    %29 = arith.mulf %28, %25 : vector<4x16x128xf32>
    %30 = arith.select %27, %25, %29 : vector<4x16x128xi1>, vector<4x16x128xf32>
    %31 = arith.truncf %30 : vector<4x16x128xf32> to vector<4x16x128xbf16>
    %c0_31 = arith.constant 0 : index
    %c8_32 = arith.constant 8 : index
    %c0_33 = arith.constant 0 : index
    %32 = vector.load %arg9[%c0_31, %c8_32, %c0_33] : memref<4x26x128xbf16, #tpu.memory_space<vmem>>, vector<4x16x128xbf16>
    tpu.vector_store %arg9[%c0_31, %c8_32, %c0_33], %31 {strides = array<i32>} : memref<4x26x128xbf16, #tpu.memory_space<vmem>>, vector<4x16x128xbf16>,
    %c0_34 = arith.constant 0 : index
    %c6_35 = arith.constant 6 : index
    %c0_36 = arith.constant 0 : index
    %33 = vector.load %arg9[%c0_34, %c6_35, %c0_36] : memref<4x26x128xbf16, #tpu.memory_space<vmem>>, vector<4x16x128xbf16>
    %c1_37 = arith.constant 1 : index
    %c0_38 = arith.constant 0 : index
    %c0_39 = arith.constant 0 : index
    %c0_40 = arith.constant 0 : index
    %34 = vector.load %arg4[%c1_37, %c0_38, %c0_39, %c0_40] : memref<4x3x128x128xbf16, #tpu.memory_space<vmem>>, vector<1x1x128x128xbf16>
    %35 = vector.shape_cast %34 : vector<1x1x128x128xbf16> to vector<128x128xbf16>
    "tpu.trace_start"() <{level = 10 : i32, message = "bqd,de->bqe"}> : () -> ()
    %cst_41 = arith.constant dense<0.000000e+00> : vector<4x16x128xf32>
    %36 = tpu.matmul %33, %35, %cst_41 {dimension_numbers = #tpu.dot_dimension_numbers<[2], [0], [0, 1], [1], [0, 0, 0, 1, 1, 1], [], []>} : vector<4x16x128xbf16>, vector<128x128xbf16>, vector<4x16x128xf32> -> vector<4x16x128xf32>
    "tpu.trace_stop"() : () -> ()
    %c0_42 = arith.constant 0 : index
    %c8_43 = arith.constant 8 : index
    %c0_44 = arith.constant 0 : index
    %37 = vector.load %arg9[%c0_42, %c8_43, %c0_44] : memref<4x26x128xbf16, #tpu.memory_space<vmem>>, vector<4x16x128xbf16>
    %c1_45 = arith.constant 1 : index
    %c1_46 = arith.constant 1 : index
    %c0_47 = arith.constant 0 : index
    %c0_48 = arith.constant 0 : index
    %38 = vector.load %arg4[%c1_45, %c1_46, %c0_47, %c0_48] : memref<4x3x128x128xbf16, #tpu.memory_space<vmem>>, vector<1x1x128x128xbf16>
    %39 = vector.shape_cast %38 : vector<1x1x128x128xbf16> to vector<128x128xbf16>
    "tpu.trace_start"() <{level = 10 : i32, message = "bqd,de->bqe"}> : () -> ()
    %cst_49 = arith.constant dense<0.000000e+00> : vector<4x16x128xf32>
    %40 = tpu.matmul %37, %39, %cst_49 {dimension_numbers = #tpu.dot_dimension_numbers<[2], [0], [0, 1], [1], [0, 0, 0, 1, 1, 1], [], []>} : vector<4x16x128xbf16>, vector<128x128xbf16>, vector<4x16x128xf32> -> vector<4x16x128xf32>
    "tpu.trace_stop"() : () -> ()
    %41 = arith.addf %36, %40 : vector<4x16x128xf32>
    %c0_50 = arith.constant 0 : index
    %c10_51 = arith.constant 10 : index
    %c0_52 = arith.constant 0 : index
    %42 = vector.load %arg9[%c0_50, %c10_51, %c0_52] : memref<4x26x128xbf16, #tpu.memory_space<vmem>>, vector<4x16x128xbf16>
    %c1_53 = arith.constant 1 : index
    %c2_54 = arith.constant 2 : index
    %c0_55 = arith.constant 0 : index
    %c0_56 = arith.constant 0 : index
    %43 = vector.load %arg4[%c1_53, %c2_54, %c0_55, %c0_56] : memref<4x3x128x128xbf16, #tpu.memory_space<vmem>>, vector<1x1x128x128xbf16>
    %44 = vector.shape_cast %43 : vector<1x1x128x128xbf16> to vector<128x128xbf16>
    "tpu.trace_start"() <{level = 10 : i32, message = "bqd,de->bqe"}> : () -> ()
    %cst_57 = arith.constant dense<0.000000e+00> : vector<4x16x128xf32>
    %45 = tpu.matmul %42, %44, %cst_57 {dimension_numbers = #tpu.dot_dimension_numbers<[2], [0], [0, 1], [1], [0, 0, 0, 1, 1, 1], [], []>} : vector<4x16x128xbf16>, vector<128x128xbf16>, vector<4x16x128xf32> -> vector<4x16x128xf32>
    "tpu.trace_stop"() : () -> ()
    %46 = arith.addf %41, %45 : vector<4x16x128xf32>
    %c1_58 = arith.constant 1 : index
    %c0_59 = arith.constant 0 : index
    %47 = vector.load %arg5[%c1_58, %c0_59] : memref<4x128xf32, #tpu.memory_space<vmem>>, vector<1x128xf32>
    %48 = vector.shape_cast %47 : vector<1x128xf32> to vector<128xf32>
    %49 = vector.shape_cast %48 : vector<128xf32> to vector<1x1x128xf32>
    %50 = vector.broadcast %49 : vector<1x1x128xf32> to vector<4x16x128xf32>
    %51 = arith.addf %46, %50 : vector<4x16x128xf32>
    %cst_60 = arith.constant 0.000000e+00 : f32
    %52 = vector.broadcast %cst_60 : f32 to vector<4x16x128xf32>
    %53 = arith.cmpf oge, %51, %52 : vector<4x16x128xf32>
    %cst_61 = arith.constant 0.00999999977 : f32
    %54 = vector.broadcast %cst_61 : f32 to vector<4x16x128xf32>
    %55 = arith.mulf %54, %51 : vector<4x16x128xf32>
    %56 = arith.select %53, %51, %55 : vector<4x16x128xi1>, vector<4x16x128xf32>
    %57 = arith.addf %56, %3 : vector<4x16x128xf32>
    %58 = arith.truncf %4 : vector<4x16x128xf32> to vector<4x16x128xbf16>
    %c0_62 = arith.constant 0 : index
    %c8_63 = arith.constant 8 : index
    %c0_64 = arith.constant 0 : index
    %59 = vector.load %arg9[%c0_62, %c8_63, %c0_64] : memref<4x26x128xbf16, #tpu.memory_space<vmem>>, vector<4x16x128xbf16>
    tpu.vector_store %arg9[%c0_62, %c8_63, %c0_64], %58 {strides = array<i32>} : memref<4x26x128xbf16, #tpu.memory_space<vmem>>, vector<4x16x128xbf16>,
    %c0_65 = arith.constant 0 : index
    %c6_66 = arith.constant 6 : index
    %c0_67 = arith.constant 0 : index
    %60 = vector.load %arg9[%c0_65, %c6_66, %c0_67] : memref<4x26x128xbf16, #tpu.memory_space<vmem>>, vector<4x16x128xbf16>
    %c2_68 = arith.constant 2 : index
    %c0_69 = arith.constant 0 : index
    %c0_70 = arith.constant 0 : index
    %c0_71 = arith.constant 0 : index
    %61 = vector.load %arg4[%c2_68, %c0_69, %c0_70, %c0_71] : memref<4x3x128x128xbf16, #tpu.memory_space<vmem>>, vector<1x1x128x128xbf16>
    %62 = vector.shape_cast %61 : vector<1x1x128x128xbf16> to vector<128x128xbf16>
    "tpu.trace_start"() <{level = 10 : i32, message = "bqd,de->bqe"}> : () -> ()
    %cst_72 = arith.constant dense<0.000000e+00> : vector<4x16x128xf32>
    %63 = tpu.matmul %60, %62, %cst_72 {dimension_numbers = #tpu.dot_dimension_numbers<[2], [0], [0, 1], [1], [0, 0, 0, 1, 1, 1], [], []>} : vector<4x16x128xbf16>, vector<128x128xbf16>, vector<4x16x128xf32> -> vector<4x16x128xf32>
    "tpu.trace_stop"() : () -> ()
    %c0_73 = arith.constant 0 : index
    %c8_74 = arith.constant 8 : index
    %c0_75 = arith.constant 0 : index
    %64 = vector.load %arg9[%c0_73, %c8_74, %c0_75] : memref<4x26x128xbf16, #tpu.memory_space<vmem>>, vector<4x16x128xbf16>
    %c2_76 = arith.constant 2 : index
    %c1_77 = arith.constant 1 : index
    %c0_78 = arith.constant 0 : index
    %c0_79 = arith.constant 0 : index
    %65 = vector.load %arg4[%c2_76, %c1_77, %c0_78, %c0_79] : memref<4x3x128x128xbf16, #tpu.memory_space<vmem>>, vector<1x1x128x128xbf16>
    %66 = vector.shape_cast %65 : vector<1x1x128x128xbf16> to vector<128x128xbf16>
    "tpu.trace_start"() <{level = 10 : i32, message = "bqd,de->bqe"}> : () -> ()
    %cst_80 = arith.constant dense<0.000000e+00> : vector<4x16x128xf32>
    %67 = tpu.matmul %64, %66, %cst_80 {dimension_numbers = #tpu.dot_dimension_numbers<[2], [0], [0, 1], [1], [0, 0, 0, 1, 1, 1], [], []>} : vector<4x16x128xbf16>, vector<128x128xbf16>, vector<4x16x128xf32> -> vector<4x16x128xf32>
    "tpu.trace_stop"() : () -> ()
    %68 = arith.addf %63, %67 : vector<4x16x128xf32>
    %c0_81 = arith.constant 0 : index
    %c10_82 = arith.constant 10 : index
    %c0_83 = arith.constant 0 : index
    %69 = vector.load %arg9[%c0_81, %c10_82, %c0_83] : memref<4x26x128xbf16, #tpu.memory_space<vmem>>, vector<4x16x128xbf16>
    %c2_84 = arith.constant 2 : index
    %c2_85 = arith.constant 2 : index
    %c0_86 = arith.constant 0 : index
    %c0_87 = arith.constant 0 : index
    %70 = vector.load %arg4[%c2_84, %c2_85, %c0_86, %c0_87] : memref<4x3x128x128xbf16, #tpu.memory_space<vmem>>, vector<1x1x128x128xbf16>
    %71 = vector.shape_cast %70 : vector<1x1x128x128xbf16> to vector<128x128xbf16>
    "tpu.trace_start"() <{level = 10 : i32, message = "bqd,de->bqe"}> : () -> ()
    %cst_88 = arith.constant dense<0.000000e+00> : vector<4x16x128xf32>
    %72 = tpu.matmul %69, %71, %cst_88 {dimension_numbers = #tpu.dot_dimension_numbers<[2], [0], [0, 1], [1], [0, 0, 0, 1, 1, 1], [], []>} : vector<4x16x128xbf16>, vector<128x128xbf16>, vector<4x16x128xf32> -> vector<4x16x128xf32>
    "tpu.trace_stop"() : () -> ()
    %73 = arith.addf %68, %72 : vector<4x16x128xf32>
    %c2_89 = arith.constant 2 : index
    %c0_90 = arith.constant 0 : index
    %74 = vector.load %arg5[%c2_89, %c0_90] : memref<4x128xf32, #tpu.memory_space<vmem>>, vector<1x128xf32>
    %75 = vector.shape_cast %74 : vector<1x128xf32> to vector<128xf32>
    %76 = vector.shape_cast %75 : vector<128xf32> to vector<1x1x128xf32>
    %77 = vector.broadcast %76 : vector<1x1x128xf32> to vector<4x16x128xf32>
    %78 = arith.addf %73, %77 : vector<4x16x128xf32>
    %cst_91 = arith.constant 0.000000e+00 : f32
    %79 = vector.broadcast %cst_91 : f32 to vector<4x16x128xf32>
    %80 = arith.cmpf oge, %78, %79 : vector<4x16x128xf32>
    %cst_92 = arith.constant 0.00999999977 : f32
    %81 = vector.broadcast %cst_92 : f32 to vector<4x16x128xf32>
    %82 = arith.mulf %81, %78 : vector<4x16x128xf32>
    %83 = arith.select %80, %78, %82 : vector<4x16x128xi1>, vector<4x16x128xf32>
    %84 = arith.truncf %83 : vector<4x16x128xf32> to vector<4x16x128xbf16>
    %c0_93 = arith.constant 0 : index
    %c8_94 = arith.constant 8 : index
    %c0_95 = arith.constant 0 : index
    %85 = vector.load %arg9[%c0_93, %c8_94, %c0_95] : memref<4x26x128xbf16, #tpu.memory_space<vmem>>, vector<4x16x128xbf16>
    tpu.vector_store %arg9[%c0_93, %c8_94, %c0_95], %84 {strides = array<i32>} : memref<4x26x128xbf16, #tpu.memory_space<vmem>>, vector<4x16x128xbf16>,
    %c0_96 = arith.constant 0 : index
    %c6_97 = arith.constant 6 : index
    %c0_98 = arith.constant 0 : index
    %86 = vector.load %arg9[%c0_96, %c6_97, %c0_98] : memref<4x26x128xbf16, #tpu.memory_space<vmem>>, vector<4x16x128xbf16>
    %c3 = arith.constant 3 : index
    %c0_99 = arith.constant 0 : index
    %c0_100 = arith.constant 0 : index
    %c0_101 = arith.constant 0 : index
    %87 = vector.load %arg4[%c3, %c0_99, %c0_100, %c0_101] : memref<4x3x128x128xbf16, #tpu.memory_space<vmem>>, vector<1x1x128x128xbf16>
    %88 = vector.shape_cast %87 : vector<1x1x128x128xbf16> to vector<128x128xbf16>
    "tpu.trace_start"() <{level = 10 : i32, message = "bqd,de->bqe"}> : () -> ()
    %cst_102 = arith.constant dense<0.000000e+00> : vector<4x16x128xf32>
    %89 = tpu.matmul %86, %88, %cst_102 {dimension_numbers = #tpu.dot_dimension_numbers<[2], [0], [0, 1], [1], [0, 0, 0, 1, 1, 1], [], []>} : vector<4x16x128xbf16>, vector<128x128xbf16>, vector<4x16x128xf32> -> vector<4x16x128xf32>
    "tpu.trace_stop"() : () -> ()
    %c0_103 = arith.constant 0 : index
    %c8_104 = arith.constant 8 : index
    %c0_105 = arith.constant 0 : index
    %90 = vector.load %arg9[%c0_103, %c8_104, %c0_105] : memref<4x26x128xbf16, #tpu.memory_space<vmem>>, vector<4x16x128xbf16>
    %c3_106 = arith.constant 3 : index
    %c1_107 = arith.constant 1 : index
    %c0_108 = arith.constant 0 : index
    %c0_109 = arith.constant 0 : index
    %91 = vector.load %arg4[%c3_106, %c1_107, %c0_108, %c0_109] : memref<4x3x128x128xbf16, #tpu.memory_space<vmem>>, vector<1x1x128x128xbf16>
    %92 = vector.shape_cast %91 : vector<1x1x128x128xbf16> to vector<128x128xbf16>
    "tpu.trace_start"() <{level = 10 : i32, message = "bqd,de->bqe"}> : () -> ()
    %cst_110 = arith.constant dense<0.000000e+00> : vector<4x16x128xf32>
    %93 = tpu.matmul %90, %92, %cst_110 {dimension_numbers = #tpu.dot_dimension_numbers<[2], [0], [0, 1], [1], [0, 0, 0, 1, 1, 1], [], []>} : vector<4x16x128xbf16>, vector<128x128xbf16>, vector<4x16x128xf32> -> vector<4x16x128xf32>
    "tpu.trace_stop"() : () -> ()
    %94 = arith.addf %89, %93 : vector<4x16x128xf32>
    %c0_111 = arith.constant 0 : index
    %c10_112 = arith.constant 10 : index
    %c0_113 = arith.constant 0 : index
    %95 = vector.load %arg9[%c0_111, %c10_112, %c0_113] : memref<4x26x128xbf16, #tpu.memory_space<vmem>>, vector<4x16x128xbf16>
    %c3_114 = arith.constant 3 : index
    %c2_115 = arith.constant 2 : index
    %c0_116 = arith.constant 0 : index
    %c0_117 = arith.constant 0 : index
    %96 = vector.load %arg4[%c3_114, %c2_115, %c0_116, %c0_117] : memref<4x3x128x128xbf16, #tpu.memory_space<vmem>>, vector<1x1x128x128xbf16>
    %97 = vector.shape_cast %96 : vector<1x1x128x128xbf16> to vector<128x128xbf16>
    "tpu.trace_start"() <{level = 10 : i32, message = "bqd,de->bqe"}> : () -> ()
    %cst_118 = arith.constant dense<0.000000e+00> : vector<4x16x128xf32>
    %98 = tpu.matmul %95, %97, %cst_118 {dimension_numbers = #tpu.dot_dimension_numbers<[2], [0], [0, 1], [1], [0, 0, 0, 1, 1, 1], [], []>} : vector<4x16x128xbf16>, vector<128x128xbf16>, vector<4x16x128xf32> -> vector<4x16x128xf32>
    "tpu.trace_stop"() : () -> ()
    %99 = arith.addf %94, %98 : vector<4x16x128xf32>
    %c3_119 = arith.constant 3 : index
    %c0_120 = arith.constant 0 : index
    %100 = vector.load %arg5[%c3_119, %c0_120] : memref<4x128xf32, #tpu.memory_space<vmem>>, vector<1x128xf32>
    %101 = vector.shape_cast %100 : vector<1x128xf32> to vector<128xf32>
    %102 = vector.shape_cast %101 : vector<128xf32> to vector<1x1x128xf32>
    %103 = vector.broadcast %102 : vector<1x1x128xf32> to vector<4x16x128xf32>
    %104 = arith.addf %99, %103 : vector<4x16x128xf32>
    %cst_121 = arith.constant 0.000000e+00 : f32
    %105 = vector.broadcast %cst_121 : f32 to vector<4x16x128xf32>
    %106 = arith.cmpf oge, %104, %105 : vector<4x16x128xf32>
    %cst_122 = arith.constant 0.00999999977 : f32
    %107 = vector.broadcast %cst_122 : f32 to vector<4x16x128xf32>
    %108 = arith.mulf %107, %104 : vector<4x16x128xf32>
    %109 = arith.select %106, %104, %108 : vector<4x16x128xi1>, vector<4x16x128xf32>
    %110 = arith.addf %109, %4 : vector<4x16x128xf32>
    %111 = arith.truncf %57 : vector<4x16x128xf32> to vector<4x16x128xbf16>
    %c0_123 = arith.constant 0 : index
    %c0_124 = arith.constant 0 : index
    %c0_125 = arith.constant 0 : index
    %112 = vector.load %arg6[%c0_123, %c0_124, %c0_125] : memref<2x128x128xbf16, #tpu.memory_space<vmem>>, vector<1x128x128xbf16>
    %113 = vector.shape_cast %112 : vector<1x128x128xbf16> to vector<128x128xbf16>
    "tpu.trace_start"() <{level = 10 : i32, message = "bqd,de->bqe"}> : () -> ()
    %cst_126 = arith.constant dense<0.000000e+00> : vector<4x16x128xf32>
    %114 = tpu.matmul %111, %113, %cst_126 {dimension_numbers = #tpu.dot_dimension_numbers<[2], [0], [0, 1], [1], [0, 0, 0, 1, 1, 1], [], []>} : vector<4x16x128xbf16>, vector<128x128xbf16>, vector<4x16x128xf32> -> vector<4x16x128xf32>
    "tpu.trace_stop"() : () -> ()
    %115 = arith.truncf %110 : vector<4x16x128xf32> to vector<4x16x128xbf16>
    %c1_127 = arith.constant 1 : index
    %c0_128 = arith.constant 0 : index
    %c0_129 = arith.constant 0 : index
    %116 = vector.load %arg6[%c1_127, %c0_128, %c0_129] : memref<2x128x128xbf16, #tpu.memory_space<vmem>>, vector<1x128x128xbf16>
    %117 = vector.shape_cast %116 : vector<1x128x128xbf16> to vector<128x128xbf16>
    "tpu.trace_start"() <{level = 10 : i32, message = "bqd,de->bqe"}> : () -> ()
    %cst_130 = arith.constant dense<0.000000e+00> : vector<4x16x128xf32>
    %118 = tpu.matmul %115, %117, %cst_130 {dimension_numbers = #tpu.dot_dimension_numbers<[2], [0], [0, 1], [1], [0, 0, 0, 1, 1, 1], [], []>} : vector<4x16x128xbf16>, vector<128x128xbf16>, vector<4x16x128xf32> -> vector<4x16x128xf32>
    "tpu.trace_stop"() : () -> ()
    %119 = arith.addf %114, %118 : vector<4x16x128xf32>
    %c0_131 = arith.constant 0 : index
    %c0_132 = arith.constant 0 : index
    %c0_133 = arith.constant 0 : index
    %120 = vector.load %arg1[%c0_131, %c0_132, %c0_133] : memref<4x1x128xf32, #tpu.memory_space<vmem>>, vector<4x1x128xf32>
    %121 = vector.broadcast %120 : vector<4x1x128xf32> to vector<4x16x128xf32>
    %122 = arith.addf %119, %121 : vector<4x16x128xf32>
    %123 = arith.addf %122, %4 : vector<4x16x128xf32>
    %c0_134 = arith.constant 0 : index
    %c0_135 = arith.constant 0 : index
    %c0_136 = arith.constant 0 : index
    %124 = vector.load %arg7[%c0_134, %c0_135, %c0_136] : memref<4x16x128xf32, #tpu.memory_space<vmem>>, vector<4x16x128xf32>
    tpu.vector_store %arg7[%c0_134, %c0_135, %c0_136], %57 {strides = array<i32>} : memref<4x16x128xf32, #tpu.memory_space<vmem>>, vector<4x16x128xf32>,
    %c0_137 = arith.constant 0 : index
    %c0_138 = arith.constant 0 : index
    %c0_139 = arith.constant 0 : index
    %125 = vector.load %arg8[%c0_137, %c0_138, %c0_139] : memref<4x16x128xf32, #tpu.memory_space<vmem>>, vector<4x16x128xf32>
    tpu.vector_store %arg8[%c0_137, %c0_138, %c0_139], %123 {strides = array<i32>} : memref<4x16x128xf32, #tpu.memory_space<vmem>>, vector<4x16x128xf32>,
    return
  }
  func.func @transform_0(%arg0: i32) -> (i32, i32, i32) {
    %c0_i32 = arith.constant 0 : i32
    %c0_i32_0 = arith.constant 0 : i32
    %c0_i32_1 = arith.constant 0 : i32
    return %arg0, %c0_i32, %c0_i32_0 : i32, i32, i32
  }
  func.func @transform_1(%arg0: i32) -> (i32, i32, i32) {
    %c0_i32 = arith.constant 0 : i32
    %c0_i32_0 = arith.constant 0 : i32
    %c0_i32_1 = arith.constant 0 : i32
    return %arg0, %c0_i32, %c0_i32_0 : i32, i32, i32
  }
  func.func @transform_2(%arg0: i32) -> (i32, i32, i32) {
    %c0_i32 = arith.constant 0 : i32
    %c0_i32_0 = arith.constant 0 : i32
    %c0_i32_1 = arith.constant 0 : i32
    return %arg0, %c0_i32, %c0_i32_0 : i32, i32, i32
  }
  func.func @transform_3(%arg0: i32) -> (i32, i32, i32, i32) {
    %c0_i32 = arith.constant 0 : i32
    %c0_i32_0 = arith.constant 0 : i32
    %c0_i32_1 = arith.constant 0 : i32
    %c0_i32_2 = arith.constant 0 : i32
    %c0_i32_3 = arith.constant 0 : i32
    return %c0_i32, %c0_i32_0, %c0_i32_1, %c0_i32_2 : i32, i32, i32, i32
  }
  func.func @transform_4(%arg0: i32) -> (i32, i32) {
    %c0_i32 = arith.constant 0 : i32
    %c0_i32_0 = arith.constant 0 : i32
    %c0_i32_1 = arith.constant 0 : i32
    return %c0_i32, %c0_i32_0 : i32, i32
  }
  func.func @transform_5(%arg0: i32) -> (i32, i32, i32) {
    %c0_i32 = arith.constant 0 : i32
    %c0_i32_0 = arith.constant 0 : i32
    %c0_i32_1 = arith.constant 0 : i32
    %c0_i32_2 = arith.constant 0 : i32
    return %c0_i32, %c0_i32_0, %c0_i32_1 : i32, i32, i32
  }
  func.func @transform_6(%arg0: i32) -> (i32, i32, i32) {
    %c0_i32 = arith.constant 0 : i32
    %c0_i32_0 = arith.constant 0 : i32
    %c0_i32_1 = arith.constant 0 : i32
    return %arg0, %c0_i32, %c0_i32_0 : i32, i32, i32
  }
  func.func @transform_7(%arg0: i32) -> (i32, i32, i32) {
    %c0_i32 = arith.constant 0 : i32
    %c0_i32_0 = arith.constant 0 : i32
    %c0_i32_1 = arith.constant 0 : i32
    return %arg0, %c0_i32, %c0_i32_0 : i32, i32, i32
  }
}

</mosaic_0001>

<bundles_post_ra>
// kernel: decoder_layer.1
= control target key start
LH: loop header
LB: loop body
LE: loop exit
PB: predicated region body
PF: predicated region fallthrough
CT: control target
= control target key end

     0   :  { %13 = vsyncpa [#allocation4], 0  ;;  %s3764_s0 = inlined_call_operand.vmem [shape: f32[4,1,128], index: 0, kind: input, shape index: {}]   ;;  %s3765_s1 = inlined_call_operand.hbm [shape: f32[4,16,128], index: 1, kind: input, shape index: {}]   ;;  %s3766_s2 = inlined_call_operand.hbm [shape: f32[4,16,128], index: 2, kind: input, shape index: {}]   ;;  %s3767_s3 = inlined_call_operand.hbm [shape: bf16[4,3,128,128], index: 3, kind: input, shape index: {}]   ;;  %s3768_s4 = inlined_call_operand.vmem [shape: f32[4,128], index: 4, kind: input, shape index: {}]   ;;  %s3769_s5 = inlined_call_operand.vmem [shape: bf16[2,128,128], index: 5, kind: input, shape index: {}]   ;;  %s3770_s6 = inlined_call_operand.hbm [shape: f32[4,16,128], index: 6, kind: output, shape index: {0}]   ;;  %s3771_s7 = inlined_call_operand.hbm [shape: f32[4,16,128], index: 7, kind: output, shape index: {1}]  }
   0x1   :  { %14 = vsyncpa [#allocation7], 0 }
   0x2   :  { %15 = vsyncpa [#allocation5], 0 }
   0x3   :  { %16 = vsyncpa [#allocation11], 0  ;;  %s36_s26 = sshll.u32 %s3766_s2, 4  ;;  %s3359_s27 = smov [#allocation6]   ;;  %s37_s26 = int_to_ptr.hbm [resolvable:$true] %s36_s26 }
   0x4   :  { %s38_s28 = sshll.u32 %s3359_s27, 4  ;;  %s23_s8 = sshll.u32 %s3765_s1, 4  ;;  %s39_s28 = int_to_ptr.vmem [resolvable:$true] %s38_s28  ;;  %s24_s8 = int_to_ptr.hbm [resolvable:$true] %s23_s8 }
   0x5   :  { %s3360_s9 = smov 128   ;;  %s3361_s10 = smov 8  }
   0x6   :  { %44 = dma.hbm_to_vmem [thread:$0]  %s37_s26, 1024, %s39_s28, [#allocation7], %s3360_s9, %s3360_s9, %s3361_s10  }
   0x7   :  { %s3362_s11 = smov [#allocation3]   ;;  %s49_s2 = sshll.u32 %s3767_s3, 4  ;;  %s50_s2 = int_to_ptr.hbm [resolvable:$true] %s49_s2 }
   0x8   :  { %s25_s12 = sshll.u32 %s3362_s11, 4  ;;  %s3363_s1 = smov [#allocation8]   ;;  %s26_s12 = int_to_ptr.vmem [resolvable:$true] %s25_s12 }
   0x9   :  { %31 = dma.hbm_to_vmem [thread:$0]  %s24_s8, 1024, %s26_s12, [#allocation4], %s3360_s9, %s3360_s9, %s3361_s10  }
   0xa   :  { %s51_s15 = sshll.u32 %s3363_s1, 4  ;;  %s3364_s16 = smov 64   ;;  %s52_s15 = int_to_ptr.vmem [resolvable:$true] %s51_s15 }
   0xb   :  { %s3365_s17 = smov 4  }
   0xc   :  { %57 = dma.hbm_to_vmem [thread:$0]  %s50_s2, 12288, %s52_s15, [#allocation7], %s3364_s16, %s3364_s16, %s3365_s17  }
   0xd   :  { %3351 = dma.done.wait [#allocation4], 1024  }
   0xe   :  { %3352 = vsyncadd [#allocation4], 4294966272 }
   0xf   :  { %3353 = dma.done.wait [#allocation7], 13312  }
  0x10   :  { %3354 = vsyncadd [#allocation7], 4294953984  ;;  %v3366_v0 = vmov 0   ;;  %v3072_v1 = vld [vmem:[#allocation8 + $0x78] sm:$0xff]  ;;  %v3071_v3 = vld [vmem:[#allocation8 + $0x70] sm:$0xff]  ;;  %vm285_vm0 = vcmask 1040384  }
  0x11   :  { %81 = vst [vmem:[#allocation2 + $0x20] sm:$0xf] %v3366_v0  ;;  %v3060_v2 = vld [vmem:[#allocation8 + $0x38] sm:$0xff]  ;;  %3181 = vmatpush.bf16.msra.mxu2 %v3072_v1  ;;  %v3059_v4 = vld [vmem:[#allocation8 + $0x30] sm:$0xff]  ;;  %244 = vmatpush.bf16.msra.mxu0 %v3072_v1  ;;  %v91_v5 = vld [vmem:[#allocation3 + $0x20] sm:$0xff]  ;;  %vm286_vm1 = vcmask 1044484  }
  0x12   :  { %79 = vst [vmem:[#allocation2] sm:$0xf] %v3366_v0  ;;  %3189 = vmatpush.bf16.msra.mxu3 %v3060_v2  ;;  %380 = vmatpush.bf16.msra.mxu1 %v3060_v2  ;;  %v92_v6 = vld [vmem:[#allocation3 + $0x28] sm:$0xff]  ;;  %v107_v9 = vpack.c.bf16 %v91_v5, %v91_v5  ;;  %v93_v11 = vld [vmem:[#allocation3 + $0x30] sm:$0xff]  ;;  %v94_v12 = vld [vmem:[#allocation3 + $0x38] sm:$0xff]  ;;  %vm450_vm3 = vcmask 1042432  }
  0x13   :  { %80 = vst [vmem:[#allocation2 + $0x10] sm:$0xf] %v3366_v0  ;;  %v3070_v7 = vld [vmem:[#allocation8 + $0x68] sm:$0xff]  ;;  %v108_v10 = vpack.c.bf16 %v92_v6, %v92_v6  ;;  %v109_v13 = vpack.c.bf16 %v93_v11, %v93_v11  ;;  %v110_v14 = vpack.c.bf16 %v94_v12, %v94_v12  ;;  %v87_v15 = vld [vmem:[#allocation3] sm:$0xff]  ;;  %v3068_v21 = vld [vmem:[#allocation8 + $0x58] sm:$0xff]  ;;  %vm451_vm4 = vcmask 1046532  }
  0x14   :  { %82 = vst [vmem:[#allocation2 + $0x30] sm:$0xf] %v3366_v0  ;;  %v3058_v8 = vld [vmem:[#allocation8 + $0x28] sm:$0xff]  ;;  %v3069_v16 = vld [vmem:[#allocation8 + $0x60] sm:$0xff]  ;;  %v103_v18 = vpack.c.bf16 %v87_v15, %v87_v15  ;;  %v3056_v22 = vld [vmem:[#allocation8 + $0x18] sm:$0xff]  ;;  %s2461_s14 = sshll.u32 %s3770_s6, 4  ;;  %s2462_s14 = int_to_ptr.hbm [resolvable:$true] %s2461_s14 }
  0x15   :  { %83 = vst [vmem:[#allocation2 + $0xc] sm:$0x1] %v3366_v0  ;;  %3182 = vmatpush.bf16.msra.mxu2 %v3071_v3  ;;  %245 = vmatpush.bf16.msra.mxu0 %v3071_v3  ;;  %v3057_v17 = vld [vmem:[#allocation8 + $0x20] sm:$0xff]  ;;  %v88_v19 = vld [vmem:[#allocation3 + $0x8] sm:$0xff]  ;;  %v3067_v28 = vld [vmem:[#allocation8 + $0x50] sm:$0xff]  ;;  %s3368_s19 = smov [#allocation10]  }
  0x16   :  { %84 = vst [vmem:[#allocation2 + $0x1c] sm:$0x1] %v3366_v0  ;;  %3190 = vmatpush.bf16.msra.mxu3 %v3059_v4  ;;  %381 = vmatpush.bf16.msra.mxu1 %v3059_v4  ;;  %v104_v20 = vpack.c.bf16 %v88_v19, %v88_v19  ;;  %v3055_v29 = vld [vmem:[#allocation8 + $0x10] sm:$0xff]  ;;  %vm3424_vm2 = vmor %vm285_vm0, %vm286_vm1  ;;  %v3066_v38 = vld [vmem:[#allocation8 + $0x48] sm:$0xff]  ;;  %s2472_s20 = sshll.u32 %s3368_s19, 4  ;;  %s2474_s23 = sshll.u32 %s3771_s7, 4  ;;  %s2473_s20 = int_to_ptr.vmem [resolvable:$true] %s2472_s20  ;;  %s2475_s23 = int_to_ptr.hbm [resolvable:$true] %s2474_s23 }
  0x17   :  { %85 = vst [vmem:[#allocation2 + $0x2c] sm:$0x1] %v3366_v0  ;;  %v3054_v39 = vld [vmem:[#allocation8 + $0x8] sm:$0xff]  ;;  %v89_v48 = vld [vmem:[#allocation3 + $0x10] sm:$0xff]  ;;  %v3065_v49 = vld [vmem:[#allocation8 + $0x40] sm:$0xff] }
  0x18   :  { %86 = vst [vmem:[#allocation2 + $0x3c] sm:$0x1] %v3366_v0  ;;  %v125_v23 = vld [vmem:[#allocation2 + $0x20] sm:$0x8]  ;;  %v3080_v51 = vld [vmem:[#allocation8 + $0xb8] sm:$0xff]  ;;  %v105_v56 = vpack.c.bf16 %v89_v48, %v89_v48  ;;  %v3079_v62 = vld [vmem:[#allocation8 + $0xb0] sm:$0xff] }
  0x19   :  { %115 = vst [vmem:[#allocation2 + $0x24] sm:$0xf] %v107_v9  ;;  %3183 = vmatpush.bf16.msra.mxu2 %v3070_v7  ;;  %246 = vmatpush.bf16.msra.mxu0 %v3070_v7  ;;  %v2543_v27 = vrot.slane %v125_v23, 11  ;;  %v119_v36 = vld [vmem:[#allocation2] sm:$0x8]  ;;  %v90_v55 = vld [vmem:[#allocation3 + $0x18] sm:$0xff]  ;;  %vm3444_vm5 = vmor %vm450_vm3, %vm451_vm4 }
  0x1a   :  { %116 = vst [vmem:[#allocation2 + $0x28] sm:$0xf] %v108_v10  ;;  %3191 = vmatpush.bf16.msra.mxu3 %v3058_v8  ;;  %382 = vmatpush.bf16.msra.mxu1 %v3058_v8  ;;  %v2541_v41 = vrot.slane %v119_v36, 11  ;;  %v3053_v50 = vld [vmem:[#allocation8] sm:$0xff]  ;;  %v106_v57 = vpack.c.bf16 %v90_v55, %v90_v55  ;;  %v122_v2 = vld [vmem:[#allocation2 + $0x10] sm:$0x8] }
  0x1b   :  { %117 = vst [vmem:[#allocation2 + $0x34] sm:$0xf] %v109_v13  ;;  %v128_v63 = vld [vmem:[#allocation2 + $0x30] sm:$0x8]  ;;  %v3078_v6 = vld [vmem:[#allocation8 + $0xa8] sm:$0xff]  ;;  %v2542_v8 = vrot.slane %v122_v2, 11 }
  0x1c   :  { %118 = vst [vmem:[#allocation2 + $0x38] sm:$0xf] %v110_v14  ;;  %v2544_v3 = vrot.slane %v128_v63, 11  ;;  %v3077_v14 = vld [vmem:[#allocation8 + $0xa0] sm:$0xff]  ;;  %v3074_v36 = vld [vmem:[#allocation8 + $0x88] sm:$0xff]  ;;  %v3180_v30 = vld [vmem:[%s3769_s5 + $0x78] sm:$0xff] }
  0x1d   :  { %111 = vst [vmem:[#allocation2 + $0x4] sm:$0xf] %v103_v18  ;;  %3184 = vmatpush.bf16.msra.mxu2 %v3069_v16  ;;  %247 = vmatpush.bf16.msra.mxu0 %v3069_v16 }
  0x1e   :  { %3192 = vmatpush.bf16.msra.mxu3 %v3057_v17  ;;  %112 = vst [vmem:[#allocation2 + $0x8] sm:$0xf] %v104_v20  ;;  %383 = vmatpush.bf16.msra.mxu1 %v3057_v17  ;;  %v3076_v20 = vld [vmem:[#allocation8 + $0x98] sm:$0xff] }
  0x1f   :  { %113 = vst [vmem:[#allocation2 + $0x14] sm:$0xf] %v105_v56 }
  0x20   :  { %v126_v24 = vld [vmem:[#allocation2 + $0x24] sm:$0xf]  ;;  %114 = vst [vmem:[#allocation2 + $0x18] sm:$0xf] %v106_v57 }
  0x21   :  { %v127_v25 = vld [vmem:[#allocation2 + $0x28] sm:$0x7]  ;;  %v304_v26 = vrot.slane %v126_v24, 7  ;;  %3185 = vmatpush.bf16.msra.mxu2 %v3068_v21  ;;  %248 = vmatpush.bf16.msra.mxu0 %v3068_v21 }
  0x22   :  { %3193 = vmatpush.bf16.msra.mxu3 %v3056_v22  ;;  %v307_v32 = vrot.slane %v127_v25, 7  ;;  %384 = vmatpush.bf16.msra.mxu1 %v3056_v22  ;;  %v129_v52 = vld [vmem:[#allocation2 + $0x34] sm:$0xf]  ;;  %v3063_v58 = vld [vmem:[#allocation2 + $0x24] sm:$0xff] }
  0x23   :  { %v306_v31 = vrot.slane %v304_v26, 4  ;;  %v305_v35 = vsel %vm3424_vm2, %v2543_v27, %v304_v26  ;;  %v311_v60 = vrot.slane %v129_v52, 7  ;;  %v130_v0 = vld [vmem:[#allocation2 + $0x38] sm:$0x7]  ;;  %v416_v55 = vld [vmem:[#allocation2 + $0x28] sm:$0xf] }
  0x24   :  { %v120_v33 = vld [vmem:[#allocation2 + $0x4] sm:$0xf]  ;;  %v320_v46 = vunpack.c.l.b16 %v305_v35  ;;  %v314_v5 = vrot.slane %v130_v0, 7  ;;  %v3064_v24 = vld [vmem:[#allocation2 + $0x34] sm:$0xff]  ;;  %v469_v57 = vrot.slane %v416_v55, 5 }
  0x25   :  { %v290_v34 = vrot.slane %v120_v33, 7  ;;  %v121_v37 = vld [vmem:[#allocation2 + $0x8] sm:$0x7]  ;;  %3186 = vmatpush.bf16.msra.mxu2 %v3067_v28  ;;  %v308_v40 = vsel %vm3424_vm2, %v306_v31, %v307_v32  ;;  %249 = vmatpush.bf16.msra.mxu0 %v3067_v28  ;;  %v313_v4 = vrot.slane %v311_v60, 4  ;;  %v312_v11 = vsel %vm3424_vm2, %v2544_v3, %v311_v60  ;;  %v3075_v28 = vld [vmem:[#allocation8 + $0x90] sm:$0xff]  ;;  %v3116_v55 = vld [vmem:[#allocation8 + $0x1b8] sm:$0xff] }
  0x26   :  { %3194 = vmatpush.bf16.msra.mxu3 %v3055_v29  ;;  %v293_v43 = vrot.slane %v121_v37, 7  ;;  %385 = vmatpush.bf16.msra.mxu1 %v3055_v29  ;;  %v321_v47 = vunpack.c.l.b16 %v308_v40  ;;  %v3061_v61 = vld [vmem:[#allocation2 + $0x4] sm:$0xff]  ;;  %v123_v7 = vld [vmem:[#allocation2 + $0x14] sm:$0xf]  ;;  %v322_v17 = vunpack.c.l.b16 %v312_v11  ;;  %v411_v31 = vld [vmem:[#allocation2 + $0xc] sm:$0x1] }
  0x27   :  { %v292_v42 = vrot.slane %v290_v34, 4  ;;  %v291_v44 = vsel %vm3424_vm2, %v2541_v41, %v290_v34  ;;  %v124_v9 = vld [vmem:[#allocation2 + $0x18] sm:$0x7]  ;;  %v297_v10 = vrot.slane %v123_v7, 7  ;;  %v315_v12 = vsel %vm3424_vm2, %v313_v4, %v314_v5  ;;  %v410_v21 = vld [vmem:[#allocation2 + $0x8] sm:$0xf] }
  0x28   :  { %v316_v53 = vunpack.c.l.b16 %v291_v44  ;;  %v326_v59 = vpack.c.b16 %v321_v47, %v320_v46  ;;  %v300_v13 = vrot.slane %v124_v9, 7  ;;  %v323_v18 = vunpack.c.l.b16 %v315_v12  ;;  %v3062_v27 = vld [vmem:[#allocation2 + $0x14] sm:$0xff]  ;;  %v409_v29 = vld [vmem:[#allocation2 + $0x4] sm:$0xe]  ;;  %v414_v47 = vld [vmem:[#allocation2 + $0x1c] sm:$0x1] }
  0x29   :  { %v294_v45 = vsel %vm3424_vm2, %v292_v42, %v293_v43  ;;  %3187 = vmatpush.bf16.msra.mxu2 %v3066_v38  ;;  %250 = vmatpush.bf16.msra.mxu0 %v3066_v38  ;;  %v299_v15 = vrot.slane %v297_v10, 4  ;;  %v298_v16 = vsel %vm3424_vm2, %v2542_v8, %v297_v10  ;;  %v455_v26 = vrot.slane %v410_v21, 5  ;;  %v3073_v40 = vld [vmem:[#allocation8 + $0x80] sm:$0xff]  ;;  %v413_v43 = vld [vmem:[#allocation2 + $0x18] sm:$0xf]  ;;  %v3179_v37 = vld [vmem:[%s3769_s5 + $0x70] sm:$0xff] }
  0x2a   :  { %3195 = vmatpush.bf16.msra.mxu3 %v3054_v39  ;;  %386 = vmatpush.bf16.msra.mxu1 %v3054_v39  ;;  %v317_v54 = vunpack.c.l.b16 %v294_v45  ;;  %v318_v22 = vunpack.c.l.b16 %v298_v16  ;;  %v327_v25 = vpack.c.b16 %v323_v18, %v322_v17  ;;  %v2577_v33 = vrot.slane %v409_v29, 9  ;;  %v412_v46 = vld [vmem:[#allocation2 + $0x14] sm:$0xe]  ;;  %v419_v3 = vld [vmem:[#allocation2 + $0x38] sm:$0xf]  ;;  %v3085_v29 = vld [vmem:[#allocation8 + $0xe0] sm:$0xff] }
  0x2b   :  { %v301_v19 = vsel %vm3424_vm2, %v299_v15, %v300_v13  ;;  %v457_v34 = vrot.slane %v455_v26, 4  ;;  %v458_v35 = vrot.slane %v411_v31, 5  ;;  %v462_v45 = vrot.slane %v413_v43, 5  ;;  %v420_v7 = vld [vmem:[#allocation2 + $0x3c] sm:$0x1]  ;;  %v3099_v17 = vld [vmem:[#allocation8 + $0x130] sm:$0xff] }
  0x2c   :  { %v324_v1 = vpack.c.b16 %v317_v54, %v316_v53  ;;  %v319_v23 = vunpack.c.l.b16 %v301_v19  ;;  %v456_v38 = vsel %vm3444_vm5, %v2577_v33, %v455_v26  ;;  %v2578_v48 = vrot.slane %v412_v46, 9  ;;  %v3100_v16 = vld [vmem:[#allocation8 + $0x138] sm:$0xff]  ;;  %v3086_v26 = vld [vmem:[#allocation8 + $0xe8] sm:$0xff]  ;;  %v3095_v31 = vld [vmem:[#allocation8 + $0x110] sm:$0xff] }
  0x2d   :  { %3188 = vmatpush.bf16.msra.mxu2 %v3065_v49  ;;  %251 = vmatpush.bf16.msra.mxu0 %v3065_v49  ;;  %v459_v39 = vsel %vm3444_vm5, %v457_v34, %v458_v35  ;;  %v481_v41 = vunpack.c.l.b16 %v456_v38  ;;  %v464_v49 = vrot.slane %v462_v45, 4  ;;  %v476_v5 = vrot.slane %v419_v3, 5  ;;  %v3088_v19 = vld [vmem:[#allocation8 + $0xf8] sm:$0xff]  ;;  %v3094_v35 = vld [vmem:[#allocation8 + $0x108] sm:$0xff]  ;;  %v3083_v38 = vld [vmem:[#allocation8 + $0xd0] sm:$0xff] }
  0x2e   :  { %3196 = vmatpush.bf16.msra.mxu3 %v3053_v50  ;;  %387 = vmatpush.bf16.msra.mxu1 %v3053_v50  ;;  %v325_v32 = vpack.c.b16 %v319_v23, %v318_v22  ;;  %v482_v42 = vunpack.c.l.b16 %v459_v39  ;;  %v465_v50 = vrot.slane %v414_v47, 5  ;;  %v479_v10 = vrot.slane %v420_v7, 5  ;;  %v3108_v21 = vld [vmem:[#allocation8 + $0x178] sm:$0xff]  ;;  %v3087_v22 = vld [vmem:[#allocation8 + $0xf0] sm:$0xff]  ;;  %v3097_v23 = vld [vmem:[#allocation8 + $0x120] sm:$0xff] }
  0x2f   :  { %v478_v9 = vrot.slane %v476_v5, 4  ;;  %v3084_v34 = vld [vmem:[#allocation8 + $0xd8] sm:$0xff]  ;;  %v3081_v46 = vld [vmem:[#allocation8 + $0xc0] sm:$0xff]  ;;  %v3115_v3 = vld [vmem:[#allocation8 + $0x1b0] sm:$0xff] }
  0x30   :  { %262 = vmatmul.bf16.vlgmr.msra.gmra.mxu2 %v3063_v58  ;;  %252 = vmatmul.bf16.vlgmr.msra.gmra.mxu0 %v3061_v61  ;;  %v489_v44 = vpack.c.b16 %v482_v42, %v481_v41  ;;  %v466_v52 = vsel %vm3444_vm5, %v464_v49, %v465_v50  ;;  %v415_v58 = vld [vmem:[#allocation2 + $0x24] sm:$0xe]  ;;  %v471_v61 = vrot.slane %v469_v57, 4  ;;  %v3103_v42 = vld [vmem:[#allocation8 + $0x150] sm:$0xff]  ;;  %v3475_v50 = vld [vmem:[%s3768_s4] ss:$0 sm:$0xff] }
  0x31   :  { %545 = vmatpush.bf16.msrb.mxu2 %v3080_v51  ;;  %398 = vmatmul.bf16.vlgmr.msra.gmra.mxu3 %v326_v59  ;;  %v463_v51 = vsel %vm3444_vm5, %v2578_v48, %v462_v45  ;;  %v484_v54 = vunpack.c.l.b16 %v466_v52  ;;  %v417_v59 = vld [vmem:[#allocation2 + $0x2c] sm:$0x1]  ;;  %v2579_v60 = vrot.slane %v415_v58, 9  ;;  %v480_v12 = vsel %vm3444_vm5, %v478_v9, %v479_v10  ;;  %v3093_v41 = vld [vmem:[#allocation8 + $0x100] sm:$0xff] }
  0x32   :  { %388 = vmatmul.bf16.vlgmr.msra.gmra.mxu1 %v324_v1  ;;  %v483_v53 = vunpack.c.l.b16 %v463_v51  ;;  %758 = vmatpush.bf16.msrb.mxu3 %v3100_v16  ;;  %v3102_v45 = vld [vmem:[#allocation8 + $0x148] sm:$0xff]  ;;  %v3101_v48 = vld [vmem:[#allocation8 + $0x140] sm:$0xff] }
  0x33   :  { %v470_v63 = vsel %vm3444_vm5, %v2579_v60, %v469_v57  ;;  %891 = vmatpush.bf16.msrb.mxu0 %v3088_v19  ;;  %1053 = vmatpush.bf16.msrb.mxu1 %v3108_v21  ;;  %v3114_v16 = vld [vmem:[#allocation8 + $0x1a8] sm:$0xff]  ;;  %v632_v19 = vld [vmem:[#allocation2] sm:$0x8] }
  0x34   :  { %v490_v56 = vpack.c.b16 %v484_v54, %v483_v53  ;;  %v485_v1 = vunpack.c.l.b16 %v470_v63  ;;  %v3128_v54 = vld [vmem:[#allocation8 + $0x1f8] sm:$0xff] }
  0x35   :  { %546 = vmatpush.bf16.msrb.mxu2 %v3079_v62  ;;  %v472_v62 = vrot.slane %v417_v59, 5 }
  0x36   :  { %759 = vmatpush.bf16.msrb.mxu3 %v3099_v17 }
  0x37   :  { %v473_v0 = vsel %vm3444_vm5, %v471_v61, %v472_v62  ;;  %892 = vmatpush.bf16.msrb.mxu0 %v3087_v22 }
  0x38   :  { %v486_v2 = vunpack.c.l.b16 %v473_v0 }
  0x39   :  { %547 = vmatpush.bf16.msrb.mxu2 %v3078_v6  ;;  %v418_v6 = vld [vmem:[#allocation2 + $0x34] sm:$0xe] }
  0x3a   :  { %v491_v4 = vpack.c.b16 %v486_v2, %v485_v1  ;;  %v2580_v8 = vrot.slane %v418_v6, 9  ;;  %v3127_v1 = vld [vmem:[#allocation8 + $0x1f0] sm:$0xff] }
  0x3b   :  { %893 = vmatpush.bf16.msrb.mxu0 %v3086_v26  ;;  %v922_v26 = vld [vmem:[#allocation2 + $0xc] sm:$0x1] }
  0x3c   :  { %v477_v11 = vsel %vm3444_vm5, %v2580_v8, %v476_v5  ;;  %v95_v5 = vld [vmem:[#allocation6] sm:$0xff] }
  0x3d   :  { %548 = vmatpush.bf16.msrb.mxu2 %v3077_v14  ;;  %v487_v13 = vunpack.c.l.b16 %v477_v11  ;;  %v488_v14 = vunpack.c.l.b16 %v480_v12  ;;  %v1132_v9 = vpack.c.bf16 %v95_v5, %v95_v5 }
  0x3f   :  { %v492_v15 = vpack.c.b16 %v488_v14, %v487_v13  ;;  %894 = vmatpush.bf16.msrb.mxu0 %v3085_v29 }
  0x40   :  { %267 = vmatmul.bf16.gmra.mxu2 %v3064_v24  ;;  %257 = vmatmul.bf16.gmra.mxu0 %v3062_v27  ;;  %v3107_v24 = vld [vmem:[#allocation8 + $0x170] sm:$0xff]  ;;  %v3096_v27 = vld [vmem:[#allocation8 + $0x118] sm:$0xff] }
  0x41   :  { %549 = vmatpush.bf16.msrb.mxu2 %v3076_v20  ;;  %403 = vmatmul.bf16.gmra.mxu3 %v327_v25  ;;  %v3098_v20 = vld [vmem:[#allocation8 + $0x128] sm:$0xff] }
  0x42   :  { %393 = vmatmul.bf16.gmra.mxu1 %v325_v32  ;;  %760 = vmatpush.bf16.msrb.mxu3 %v3098_v20  ;;  %v3105_v32 = vld [vmem:[#allocation8 + $0x160] sm:$0xff]  ;;  %v3135_v20 = vld [vmem:[#allocation8 + $0x230] sm:$0xff] }
  0x43   :  { %1054 = vmatpush.bf16.msrb.mxu1 %v3107_v24  ;;  %895 = vmatpush.bf16.msrb.mxu0 %v3084_v34 }
  0x45   :  { %550 = vmatpush.bf16.msrb.mxu2 %v3075_v28  ;;  %v3106_v28 = vld [vmem:[#allocation8 + $0x168] sm:$0xff] }
  0x46   :  { %761 = vmatpush.bf16.msrb.mxu3 %v3097_v23  ;;  %v96_v23 = vld [vmem:[#allocation6 + $0x8] sm:$0xff] }
  0x47   :  { %1055 = vmatpush.bf16.msrb.mxu1 %v3106_v28  ;;  %896 = vmatpush.bf16.msrb.mxu0 %v3083_v38  ;;  %v2661_v28 = vrot.slane %v632_v19, 11  ;;  %v1133_v34 = vpack.c.bf16 %v96_v23, %v96_v23  ;;  %v966_v38 = vrot.slane %v922_v26, 5 }
  0x49   :  { %551 = vmatpush.bf16.msrb.mxu2 %v3074_v36  ;;  %v3104_v36 = vld [vmem:[#allocation8 + $0x158] sm:$0xff] }
  0x4a   :  { %762 = vmatpush.bf16.msrb.mxu3 %v3096_v27 }
  0x4b   :  { %1056 = vmatpush.bf16.msrb.mxu1 %v3105_v32 }
  0x4d   :  { %552 = vmatpush.bf16.msrb.mxu2 %v3073_v40 }
  0x4e   :  { %763 = vmatpush.bf16.msrb.mxu3 %v3095_v31 }
  0x4f   :  { %1057 = vmatpush.bf16.msrb.mxu1 %v3104_v36 }
  0x50   :  { %553 = vmatmul.bf16.vlgmr.msrb.gmra.mxu2 %v489_v44  ;;  %v3082_v44 = vld [vmem:[#allocation8 + $0xc8] sm:$0xff] }
  0x51   :  { %897 = vmatpush.bf16.msrb.mxu0 %v3082_v44  ;;  %1274 = vmatpush.bf16.msra.mxu2 %v3128_v54  ;;  %v3134_v54 = vld [vmem:[#allocation8 + $0x228] sm:$0xff] }
  0x52   :  { %764 = vmatpush.bf16.msrb.mxu3 %v3094_v35 }
  0x53   :  { %1058 = vmatpush.bf16.msrb.mxu1 %v3103_v42 }
  0x55   :  { %898 = vmatpush.bf16.msrb.mxu0 %v3081_v46  ;;  %1275 = vmatpush.bf16.msra.mxu2 %v3127_v1 }
  0x56   :  { %765 = vmatpush.bf16.msrb.mxu3 %v3093_v41 }
  0x57   :  { %1059 = vmatpush.bf16.msrb.mxu1 %v3102_v45 }
  0x5a   :  { %1407 = vmatpush.bf16.msra.mxu3 %v3116_v55 }
  0x5b   :  { %1060 = vmatpush.bf16.msrb.mxu1 %v3101_v48 }
  0x5e   :  { %1408 = vmatpush.bf16.msra.mxu3 %v3115_v3 }
  0x60   :  { %558 = vmatmul.bf16.gmra.mxu2 %v490_v56 }
  0x62   :  { %1409 = vmatpush.bf16.msra.mxu3 %v3114_v16  ;;  %v3123_v16 = vld [vmem:[#allocation8 + $0x1d0] sm:$0xff] }
  0x70   :  { %563 = vmatmul.bf16.gmra.mxu2 %v491_v4  ;;  %v3136_v4 = vld [vmem:[#allocation8 + $0x238] sm:$0xff] }
  0x71   :  { %1569 = vmatpush.bf16.msra.mxu0 %v3136_v4 }
  0x75   :  { %1570 = vmatpush.bf16.msra.mxu0 %v3135_v20  ;;  %v925_v20 = vld [vmem:[#allocation2 + $0x1c] sm:$0x1] }
  0x79   :  { %1571 = vmatpush.bf16.msra.mxu0 %v3134_v54 }
  0x80   :  { %568 = vmatmul.bf16.gmra.mxu2 %v492_v15  ;;  %v3126_v15 = vld [vmem:[#allocation8 + $0x1e8] sm:$0xff] }
  0x81   :  { %1276 = vmatpush.bf16.msra.mxu2 %v3126_v15  ;;  %v98_v15 = vld [vmem:[#allocation6 + $0x18] sm:$0xff] }
  0xad   :  { %v253_v39 = vpop.f32.mrf.mxu0 }
  0xaf   :  { %v389_v40 = vpop.f32.mrf.mxu1 }
  0xb0   :  { %v390_v47 = vadd.f32 %v389_v40, %v253_v39 }
  0xb3   :  { %v3464_v18 = vpop.f32.mrf.mxu2 }
  0xb4   :  { %v399_v27 = vpop.f32.mrf.mxu3 }
  0xb5   :  { %v255_v49 = vpop.f32.mrf.mxu0 }
  0xb7   :  { %v391_v51 = vpop.f32.mrf.mxu1 }
  0xb8   :  { %v392_v58 = vadd.f32 %v391_v51, %v255_v49  ;;  %v97_v49 = vld [vmem:[#allocation6 + $0x10] sm:$0xff] }
  0xbb   :  { %v3466_v25 = vpop.f32.mrf.mxu2 }
  0xbc   :  { %v401_v4 = vpop.f32.mrf.mxu3 }
  0xbd   :  { %v258_v63 = vpop.f32.mrf.mxu0 }
  0xbf   :  { %v394_v0 = vpop.f32.mrf.mxu1 }
  0xc0   :  { %v395_v6 = vadd.f32 %v394_v0, %v258_v63  ;;  %v1134_v63 = vpack.c.bf16 %v97_v49, %v97_v49 }
  0xc3   :  { %v3468_v33 = vpop.f32.mrf.mxu2 }
  0xc5   :  { %v260_v21 = vpop.f32.mrf.mxu0 }
  0xc7   :  { %v396_v22 = vpop.f32.mrf.mxu1 }
  0xc8   :  { %v397_v31 = vadd.f32 %v396_v22, %v260_v21  ;;  %v3132_v21 = vld [vmem:[#allocation8 + $0x218] sm:$0xff] }
  0xcb   :  { %v3470_v43 = vpop.f32.mrf.mxu2 }
  0xd3   :  { %v554_v52 = vpop.f32.mrf.mxu2 }
  0xd4   :  { %v574_v53 = vadd.f32 %v554_v52, %v390_v47  ;;  %v3125_v52 = vld [vmem:[#allocation8 + $0x1e0] sm:$0xff] }
  0xd5   :  { %1277 = vmatpush.bf16.msra.mxu2 %v3125_v52 }
  0xd6   :  { %v584_v56 = vadd.f32 %v3475_v50, %v574_v53  ;;  %v3113_v53 = vld [vmem:[#allocation8 + $0x1a0] sm:$0xff] }
  0xd7   :  { %1410 = vmatpush.bf16.msra.mxu3 %v3113_v53 }
  0xd8   :  { %vm592_vm6 = vcmp.ge.f32.partialorder %v584_v56, 0.0  ;;  %v600_v57 = vmul.f32 0.01, %v584_v56 }
  0xda   :  { %v608_v59 = vsel %vm592_vm6, %v584_v56, %v600_v57 }
  0xdb   :  { %v616_v60 = vpack.c.bf16 %v608_v59, %v608_v59  ;;  %v556_v61 = vpop.f32.mrf.mxu2 }
  0xdc   :  { %v575_v62 = vadd.f32 %v556_v61, %v392_v58  ;;  %v400_v61 = vadd.f32 %v399_v27, %v3464_v18  ;;  %v3112_v18 = vld [vmem:[#allocation8 + $0x198] sm:$0xff]  ;;  %v1135_v27 = vpack.c.bf16 %v98_v15, %v98_v15 }
  0xdd   :  { %624 = vst [vmem:[#allocation2 + $0x4] sm:$0xf] %v616_v60  ;;  %1411 = vmatpush.bf16.msra.mxu3 %v3112_v18 }
  0xde   :  { %v585_v2 = vadd.f32 %v3475_v50, %v575_v62 }
  0xe0   :  { %vm593_vm7 = vcmp.ge.f32.partialorder %v585_v2, 0.0  ;;  %v601_v7 = vmul.f32 0.01, %v585_v2 }
  0xe2   :  { %v609_v8 = vsel %vm593_vm7, %v585_v2, %v601_v7 }
  0xe3   :  { %v617_v10 = vpack.c.bf16 %v609_v8, %v609_v8  ;;  %v559_v11 = vpop.f32.mrf.mxu2 }
  0xe4   :  { %v576_v12 = vadd.f32 %v559_v11, %v395_v6  ;;  %v633_v13 = vld [vmem:[#allocation2 + $0x4] sm:$0xf]  ;;  %v3124_v11 = vld [vmem:[#allocation8 + $0x1d8] sm:$0xff] }
  0xe5   :  { %625 = vst [vmem:[#allocation2 + $0x8] sm:$0xf] %v617_v10  ;;  %v920_v14 = vld [vmem:[#allocation2 + $0x4] sm:$0xe]  ;;  %v801_v29 = vrot.slane %v633_v13, 7  ;;  %1278 = vmatpush.bf16.msra.mxu2 %v3124_v11  ;;  %v100_v11 = vld [vmem:[#allocation6 + $0x28] sm:$0xff] }
  0xe6   :  { %v586_v17 = vadd.f32 %v3475_v50, %v576_v12  ;;  %1140 = vst [vmem:[#allocation2 + $0x4] sm:$0xf] %v1132_v9  ;;  %v2697_v44 = vrot.slane %v920_v14, 9  ;;  %v635_v13 = vld [vmem:[#allocation2 + $0x10] sm:$0x8]  ;;  %v3133_v14 = vld [vmem:[#allocation8 + $0x220] sm:$0xff] }
  0xe7   :  { %v802_v45 = vsel %vm3424_vm2, %v2661_v28, %v801_v29  ;;  %v803_v46 = vrot.slane %v801_v29, 4  ;;  %1572 = vmatpush.bf16.msra.mxu0 %v3133_v14  ;;  %v2662_v22 = vrot.slane %v635_v13, 11 }
  0xe8   :  { %vm594_vm8 = vcmp.ge.f32.partialorder %v586_v17, 0.0  ;;  %v602_v24 = vmul.f32 0.01, %v586_v17  ;;  %v827_v59 = vunpack.c.l.b16 %v802_v45 }
  0xe9   :  { %1279 = vmatpush.bf16.msra.mxu2 %v3123_v16 }
  0xea   :  { %v610_v32 = vsel %vm594_vm8, %v586_v17, %v602_v24  ;;  %v3111_v17 = vld [vmem:[#allocation8 + $0x190] sm:$0xff]  ;;  %v402_v24 = vadd.f32 %v401_v4, %v3466_v25 }
  0xeb   :  { %v618_v35 = vpack.c.bf16 %v610_v32, %v610_v32  ;;  %v561_v36 = vpop.f32.mrf.mxu2  ;;  %1412 = vmatpush.bf16.msra.mxu3 %v3111_v17  ;;  %1573 = vmatpush.bf16.msra.mxu0 %v3132_v21  ;;  %v1137_v17 = vpack.c.bf16 %v100_v11, %v100_v11 }
  0xec   :  { %v577_v39 = vadd.f32 %v561_v36, %v397_v31  ;;  %v634_v41 = vld [vmem:[#allocation2 + $0x8] sm:$0x7]  ;;  %v973_v31 = vrot.slane %v925_v20, 5 }
  0xed   :  { %v3089_v40 = vld [vmem:[#allocation2 + $0x4] sm:$0xff]  ;;  %626 = vst [vmem:[#allocation2 + $0x14] sm:$0xf] %v618_v35  ;;  %v804_v47 = vrot.slane %v634_v41, 7 }
  0xee   :  { %v921_v42 = vld [vmem:[#allocation2 + $0x8] sm:$0xf]  ;;  %v587_v51 = vadd.f32 %v3475_v50, %v577_v39  ;;  %766 = vmatmul.bf16.vlgmr.msrb.gmra.mxu3 %v3089_v40  ;;  %v404_v39 = vpop.f32.mrf.mxu3 }
  0xef   :  { %v963_v48 = vrot.slane %v921_v42, 5  ;;  %1141 = vst [vmem:[#allocation2 + $0x8] sm:$0xf] %v1133_v34  ;;  %v805_v55 = vsel %vm3424_vm2, %v803_v46, %v804_v47  ;;  %v99_v46 = vld [vmem:[#allocation6 + $0x20] sm:$0xff]  ;;  %v3110_v47 = vld [vmem:[#allocation8 + $0x188] sm:$0xff] }
  0xf0   :  { %vm595_vm9 = vcmp.ge.f32.partialorder %v587_v51, 0.0  ;;  %v603_v58 = vmul.f32 0.01, %v587_v51  ;;  %v828_v60 = vunpack.c.l.b16 %v805_v55  ;;  %1413 = vmatpush.bf16.msra.mxu3 %v3110_v47 }
  0xf1   :  { %v964_v56 = vsel %vm3444_vm5, %v2697_v44, %v963_v48  ;;  %v965_v57 = vrot.slane %v963_v48, 4  ;;  %v3122_v44 = vld [vmem:[#allocation8 + $0x1c8] sm:$0xff]  ;;  %v3131_v48 = vld [vmem:[#allocation8 + $0x210] sm:$0xff] }
  0xf2   :  { %v611_v0 = vsel %vm595_vm9, %v587_v51, %v603_v58  ;;  %v835_v1 = vpack.c.b16 %v828_v60, %v827_v59  ;;  %v989_v2 = vunpack.c.l.b16 %v964_v56  ;;  %1280 = vmatpush.bf16.msra.mxu2 %v3122_v44  ;;  %1574 = vmatpush.bf16.msra.mxu0 %v3131_v48  ;;  %v405_v56 = vadd.f32 %v404_v39, %v3468_v33  ;;  %v3121_v59 = vld [vmem:[#allocation8 + $0x1c0] sm:$0xff] }
  0xf3   :  { %v967_v62 = vsel %vm3444_vm5, %v965_v57, %v966_v38  ;;  %v619_v5 = vpack.c.bf16 %v611_v0, %v611_v0  ;;  %v564_v6 = vpop.f32.mrf.mxu2  ;;  %v1136_v58 = vpack.c.bf16 %v99_v46, %v99_v46 }
  0xf4   :  { %v990_v3 = vunpack.c.l.b16 %v967_v62  ;;  %v578_v7 = vadd.f32 %v564_v6, %v400_v61  ;;  %899 = vmatmul.bf16.vlgmr.msrb.gmra.mxu0 %v835_v1  ;;  %v636_v9 = vld [vmem:[#allocation2 + $0x14] sm:$0xf] }
  0xf5   :  { %627 = vst [vmem:[#allocation2 + $0x18] sm:$0xf] %v619_v5  ;;  %v923_v10 = vld [vmem:[#allocation2 + $0x14] sm:$0xe]  ;;  %v808_v23 = vrot.slane %v636_v9, 7  ;;  %v3130_v9 = vld [vmem:[#allocation8 + $0x208] sm:$0xff] }
  0xf6   :  { %v997_v8 = vpack.c.b16 %v990_v3, %v989_v2  ;;  %v588_v12 = vadd.f32 %v3475_v50, %v578_v7  ;;  %1142 = vst [vmem:[#allocation2 + $0x14] sm:$0xf] %v1134_v63  ;;  %v2698_v38 = vrot.slane %v923_v10, 9  ;;  %1281 = vmatpush.bf16.msra.mxu2 %v3121_v59  ;;  %v3117_v6 = vld [vmem:[#allocation2 + $0x4] sm:$0xff]  ;;  %v638_v7 = vld [vmem:[#allocation2 + $0x20] sm:$0x8]  ;;  %v406_v10 = vpop.f32.mrf.mxu3  ;;  %1575 = vmatpush.bf16.msra.mxu0 %v3130_v9 }
  0xf7   :  { %v809_v40 = vsel %vm3424_vm2, %v2662_v22, %v808_v23  ;;  %v810_v41 = vrot.slane %v808_v23, 4  ;;  %v2663_v13 = vrot.slane %v638_v7, 11  ;;  %v407_v15 = vadd.f32 %v406_v10, %v3470_v43  ;;  %v101_v43 = vld [vmem:[#allocation6 + $0x30] sm:$0xff]  ;;  %v1437_v10 = vld [vmem:[#allocation2 + $0x8] sm:$0xf] }
  0xf8   :  { %1061 = vmatmul.bf16.vlgmr.msrb.gmra.mxu1 %v997_v8  ;;  %vm596_vm10 = vcmp.ge.f32.partialorder %v588_v12, 0.0  ;;  %v604_v19 = vmul.f32 0.01, %v588_v12  ;;  %v829_v54 = vunpack.c.l.b16 %v809_v40  ;;  %v3109_v8 = vld [vmem:[#allocation8 + $0x180] sm:$0xff] }
  0xf9   :  { %1282 = vmatmul.bf16.vlgmr.msra.gmra.mxu2 %v3117_v6  ;;  %1414 = vmatpush.bf16.msra.mxu3 %v3109_v8 }
  0xfa   :  { %v612_v26 = vsel %vm596_vm10, %v588_v12, %v604_v19  ;;  %v928_v12 = vld [vmem:[#allocation2 + $0x2c] sm:$0x1] }
  0xfb   :  { %v620_v28 = vpack.c.bf16 %v612_v26, %v612_v26  ;;  %v566_v29 = vpop.f32.mrf.mxu2  ;;  %v980_v21 = vrot.slane %v928_v12, 5 }
  0xfc   :  { %v579_v32 = vadd.f32 %v566_v29, %v402_v24  ;;  %v637_v35 = vld [vmem:[#allocation2 + $0x18] sm:$0x7] }
  0xfd   :  { %v3090_v34 = vld [vmem:[#allocation2 + $0x14] sm:$0xff]  ;;  %628 = vst [vmem:[#allocation2 + $0x24] sm:$0xf] %v620_v28  ;;  %v811_v25 = vrot.slane %v637_v35, 7  ;;  %v3129_v35 = vld [vmem:[#allocation8 + $0x200] sm:$0xff] }
  0xfe   :  { %v924_v36 = vld [vmem:[#allocation2 + $0x18] sm:$0xf]  ;;  %v589_v45 = vadd.f32 %v3475_v50, %v579_v32  ;;  %771 = vmatmul.bf16.gmra.mxu3 %v3090_v34  ;;  %1576 = vmatpush.bf16.msra.mxu0 %v3129_v35  ;;  %v1152_v35 = vld [vmem:[#allocation2 + $0x14] sm:$0xf] }
  0xff   :  { %v970_v42 = vrot.slane %v924_v36, 5  ;;  %1143 = vst [vmem:[#allocation2 + $0x18] sm:$0xf] %v1135_v27  ;;  %v812_v49 = vsel %vm3424_vm2, %v810_v41, %v811_v25 }
 0x100   :  { %vm597_vm11 = vcmp.ge.f32.partialorder %v589_v45, 0.0  ;;  %v605_v53 = vmul.f32 0.01, %v589_v45  ;;  %v830_v55 = vunpack.c.l.b16 %v812_v49 }
 0x101   :  { %v971_v51 = vsel %vm3444_vm5, %v2698_v38, %v970_v42  ;;  %v972_v52 = vrot.slane %v970_v42, 4 }
 0x102   :  { %v613_v60 = vsel %vm597_vm11, %v589_v45, %v605_v53  ;;  %v836_v61 = vpack.c.b16 %v830_v55, %v829_v54  ;;  %v991_v62 = vunpack.c.l.b16 %v971_v51  ;;  %v641_v54 = vld [vmem:[#allocation2 + $0x30] sm:$0x8]  ;;  %v102_v55 = vld [vmem:[#allocation6 + $0x38] sm:$0xff]  ;;  %2277 = vmatpush.bf16.msrb.mxu0 %v3180_v30 }
 0x103   :  { %v974_v57 = vsel %vm3444_vm5, %v972_v52, %v973_v31  ;;  %v621_v0 = vpack.c.bf16 %v613_v60, %v613_v60  ;;  %v569_v1 = vpop.f32.mrf.mxu2  ;;  %v1139_v60 = vpack.c.bf16 %v102_v55, %v102_v55 }
 0x104   :  { %v992_v63 = vunpack.c.l.b16 %v974_v57  ;;  %v580_v2 = vadd.f32 %v569_v1, %v405_v56  ;;  %904 = vmatmul.bf16.gmra.mxu0 %v836_v61  ;;  %v639_v4 = vld [vmem:[#allocation2 + $0x24] sm:$0xf]  ;;  %v931_v56 = vld [vmem:[#allocation2 + $0x3c] sm:$0x1] }
 0x105   :  { %629 = vst [vmem:[#allocation2 + $0x28] sm:$0xf] %v621_v0  ;;  %v926_v5 = vld [vmem:[#allocation2 + $0x24] sm:$0xe]  ;;  %v815_v14 = vrot.slane %v639_v4, 7  ;;  %v987_v61 = vrot.slane %v931_v56, 5 }
 0x106   :  { %v998_v3 = vpack.c.b16 %v992_v63, %v991_v62  ;;  %v590_v33 = vadd.f32 %v3475_v50, %v580_v2  ;;  %1144 = vst [vmem:[#allocation2 + $0x24] sm:$0xf] %v1136_v58  ;;  %v2699_v27 = vrot.slane %v926_v5, 9  ;;  %v3118_v51 = vld [vmem:[#allocation2 + $0x14] sm:$0xff]  ;;  %v1149_v57 = vld [vmem:[#allocation2 + $0x4] sm:$0xf]  ;;  %2278 = vmatpush.bf16.msrb.mxu0 %v3179_v37 }
 0x107   :  { %v816_v28 = vsel %vm3424_vm2, %v2663_v13, %v815_v14  ;;  %v817_v29 = vrot.slane %v815_v14, 4  ;;  %v2664_v58 = vrot.slane %v641_v54, 11  ;;  %v1148_v62 = vld [vmem:[#allocation2] sm:$0x8]  ;;  %v1150_v63 = vld [vmem:[#allocation2 + $0x8] sm:$0x7] }
 0x108   :  { %1066 = vmatmul.bf16.gmra.mxu1 %v998_v3  ;;  %vm598_vm12 = vcmp.ge.f32.partialorder %v590_v33, 0.0  ;;  %v606_v18 = vmul.f32 0.01, %v590_v33  ;;  %v831_v41 = vunpack.c.l.b16 %v816_v28  ;;  %v1317_v0 = vrot.slane %v1149_v57, 7 }
 0x109   :  { %1287 = vmatmul.bf16.gmra.mxu2 %v3118_v51  ;;  %v2781_v8 = vrot.slane %v1148_v62, 11  ;;  %v1320_v9 = vrot.slane %v1150_v63, 7  ;;  %v1439_v51 = vld [vmem:[#allocation2 + $0x14] sm:$0xe] }
 0x10a   :  { %v614_v16 = vsel %vm598_vm12, %v590_v33, %v606_v18  ;;  %v1319_v13 = vrot.slane %v1317_v0, 4  ;;  %v2818_v56 = vrot.slane %v1439_v51, 9 }
 0x10b   :  { %v622_v19 = vpack.c.bf16 %v614_v16, %v614_v16  ;;  %v571_v20 = vpop.f32.mrf.mxu2 }
 0x10c   :  { %v581_v22 = vadd.f32 %v571_v20, %v407_v15  ;;  %v640_v24 = vld [vmem:[#allocation2 + $0x28] sm:$0x7] }
 0x10d   :  { %v3091_v23 = vld [vmem:[#allocation2 + $0x24] sm:$0xff]  ;;  %630 = vst [vmem:[#allocation2 + $0x34] sm:$0xf] %v622_v19  ;;  %v818_v31 = vrot.slane %v640_v24, 7  ;;  %v1318_v24 = vsel %vm3424_vm2, %v2781_v8, %v1317_v0 }
 0x10e   :  { %v927_v26 = vld [vmem:[#allocation2 + $0x28] sm:$0xf]  ;;  %v591_v34 = vadd.f32 %v3475_v50, %v581_v22  ;;  %776 = vmatmul.bf16.gmra.mxu3 %v3091_v23  ;;  %v1138_v50 = vpack.c.bf16 %v101_v43, %v101_v43  ;;  %v1436_v22 = vld [vmem:[#allocation2 + $0x4] sm:$0xe]  ;;  %v1438_v23 = vld [vmem:[#allocation2 + $0xc] sm:$0x1] }
 0x10f   :  { %v977_v32 = vrot.slane %v927_v26, 5  ;;  %1145 = vst [vmem:[#allocation2 + $0x28] sm:$0xf] %v1137_v17  ;;  %v819_v36 = vsel %vm3424_vm2, %v817_v29, %v818_v31  ;;  %v1479_v17 = vrot.slane %v1437_v10, 5  ;;  %v1321_v26 = vsel %vm3424_vm2, %v1319_v13, %v1320_v9 }
 0x110   :  { %vm599_vm13 = vcmp.ge.f32.partialorder %v591_v34, 0.0  ;;  %v607_v40 = vmul.f32 0.01, %v591_v34  ;;  %v832_v25 = vunpack.c.l.b16 %v819_v36  ;;  %v2817_v29 = vrot.slane %v1436_v22, 9 }
 0x111   :  { %v978_v38 = vsel %vm3444_vm5, %v2699_v27, %v977_v32  ;;  %v979_v39 = vrot.slane %v977_v32, 4  ;;  %v1481_v31 = vrot.slane %v1479_v17, 4  ;;  %v1482_v32 = vrot.slane %v1438_v23, 5 }
 0x112   :  { %v615_v44 = vsel %vm599_vm13, %v591_v34, %v607_v40  ;;  %v837_v45 = vpack.c.b16 %v832_v25, %v831_v41  ;;  %v993_v46 = vunpack.c.l.b16 %v978_v38  ;;  %v1343_v34 = vunpack.c.l.b16 %v1318_v24 }
 0x113   :  { %v981_v42 = vsel %vm3444_vm5, %v979_v39, %v980_v21  ;;  %v623_v48 = vpack.c.bf16 %v615_v44, %v615_v44  ;;  %v1344_v43 = vunpack.c.l.b16 %v1321_v26  ;;  %v1480_v36 = vsel %vm3444_vm5, %v2817_v29, %v1479_v17  ;;  %v1440_v44 = vld [vmem:[#allocation2 + $0x18] sm:$0xf] }
 0x114   :  { %v994_v47 = vunpack.c.l.b16 %v981_v42  ;;  %909 = vmatmul.bf16.gmra.mxu0 %v837_v45  ;;  %v642_v52 = vld [vmem:[#allocation2 + $0x34] sm:$0xf]  ;;  %v1483_v38 = vsel %vm3444_vm5, %v1481_v31, %v1482_v32  ;;  %v1324_v40 = vrot.slane %v1152_v35, 7  ;;  %v1505_v41 = vunpack.c.l.b16 %v1480_v36  ;;  %v1151_v42 = vld [vmem:[#allocation2 + $0x10] sm:$0x8] }
 0x115   :  { %631 = vst [vmem:[#allocation2 + $0x38] sm:$0xf] %v623_v48  ;;  %v929_v53 = vld [vmem:[#allocation2 + $0x34] sm:$0xe]  ;;  %v822_v59 = vrot.slane %v642_v52, 7  ;;  %v1351_v39 = vpack.c.b16 %v1344_v43, %v1343_v34  ;;  %v1506_v25 = vunpack.c.l.b16 %v1483_v38  ;;  %v2782_v45 = vrot.slane %v1151_v42, 11 }
 0x116   :  { %v999_v49 = vpack.c.b16 %v994_v47, %v993_v46  ;;  %1146 = vst [vmem:[#allocation2 + $0x34] sm:$0xf] %v1138_v50  ;;  %v2700_v4 = vrot.slane %v929_v53, 9  ;;  %v3119_v28 = vld [vmem:[#allocation2 + $0x24] sm:$0xff]  ;;  %v1153_v50 = vld [vmem:[#allocation2 + $0x18] sm:$0x7] }
 0x117   :  { %v823_v5 = vsel %vm3424_vm2, %v2664_v58, %v822_v59  ;;  %v824_v6 = vrot.slane %v822_v59, 4  ;;  %v1326_v46 = vrot.slane %v1324_v40, 4  ;;  %v1327_v47 = vrot.slane %v1153_v50, 7  ;;  %v1441_v52 = vld [vmem:[#allocation2 + $0x1c] sm:$0x1] }
 0x118   :  { %1071 = vmatmul.bf16.gmra.mxu1 %v999_v49  ;;  %v833_v14 = vunpack.c.l.b16 %v823_v5  ;;  %v1513_v48 = vpack.c.b16 %v1506_v25, %v1505_v41  ;;  %v1486_v49 = vrot.slane %v1440_v44, 5  ;;  %v1325_v53 = vsel %vm3424_vm2, %v2782_v45, %v1324_v40  ;;  %v1156_v5 = vld [vmem:[#allocation2 + $0x28] sm:$0x7] }
 0x119   :  { %1292 = vmatmul.bf16.gmra.mxu2 %v3119_v28  ;;  %v1328_v54 = vsel %vm3424_vm2, %v1326_v46, %v1327_v47  ;;  %v1489_v58 = vrot.slane %v1441_v52, 5  ;;  %v1345_v59 = vunpack.c.l.b16 %v1325_v53  ;;  %v1334_v8 = vrot.slane %v1156_v5, 7  ;;  %v1157_v28 = vld [vmem:[#allocation2 + $0x30] sm:$0x8]  ;;  %v3144_v5 = vld [vmem:[#allocation8 + $0x278] sm:$0xff] }
 0x11a   :  { %v1488_v57 = vrot.slane %v1486_v49, 4  ;;  %v1487_v62 = vsel %vm3444_vm5, %v2818_v56, %v1486_v49  ;;  %v2784_v32 = vrot.slane %v1157_v28, 11  ;;  %v3556_v56 = vld [vmem:[%s3768_s4 + $0x1] ss:$0 sm:$0xff]  ;;  %1915 = vmatpush.bf16.msrb.mxu2 %v3144_v5 }
 0x11c   :  { %v643_v2 = vld [vmem:[#allocation2 + $0x38] sm:$0x7]  ;;  %v1490_v63 = vsel %vm3444_vm5, %v1488_v57, %v1489_v58 }
 0x11d   :  { %v3092_v1 = vld [vmem:[#allocation2 + $0x34] sm:$0xff]  ;;  %v825_v33 = vrot.slane %v643_v2, 7  ;;  %v1507_v2 = vunpack.c.l.b16 %v1487_v62 }
 0x11e   :  { %v930_v3 = vld [vmem:[#allocation2 + $0x38] sm:$0xf]  ;;  %781 = vmatmul.bf16.gmra.mxu3 %v3092_v1  ;;  %v1445_v38 = vld [vmem:[#allocation2 + $0x34] sm:$0xe] }
 0x11f   :  { %v984_v7 = vrot.slane %v930_v3, 5  ;;  %1147 = vst [vmem:[#allocation2 + $0x38] sm:$0xf] %v1139_v60  ;;  %v826_v11 = vsel %vm3424_vm2, %v824_v6, %v825_v33  ;;  %v1346_v60 = vunpack.c.l.b16 %v1328_v54  ;;  %v1508_v3 = vunpack.c.l.b16 %v1490_v63  ;;  %v1443_v6 = vld [vmem:[#allocation2 + $0x28] sm:$0xf] }
 0x120   :  { %v834_v15 = vunpack.c.l.b16 %v826_v11  ;;  %v1493_v10 = vrot.slane %v1443_v6, 5  ;;  %v1442_v11 = vld [vmem:[#allocation2 + $0x24] sm:$0xe]  ;;  %v2820_v25 = vrot.slane %v1445_v38, 9  ;;  %v3164_v6 = vld [vmem:[#allocation8 + $0x2f8] sm:$0xff]  ;;  %v3142_v38 = vld [vmem:[#allocation8 + $0x268] sm:$0xff] }
 0x121   :  { %v985_v18 = vsel %vm3444_vm5, %v2700_v4, %v984_v7  ;;  %v986_v12 = vrot.slane %v984_v7, 4  ;;  %v1352_v0 = vpack.c.b16 %v1346_v60, %v1345_v59  ;;  %v1154_v4 = vld [vmem:[#allocation2 + $0x20] sm:$0x8]  ;;  %v1514_v9 = vpack.c.b16 %v1508_v3, %v1507_v2  ;;  %2077 = vmatpush.bf16.msrb.mxu3 %v3164_v6  ;;  %v3140_v6 = vld [vmem:[#allocation8 + $0x258] sm:$0xff] }
 0x122   :  { %v838_v19 = vpack.c.b16 %v834_v15, %v833_v14  ;;  %v995_v20 = vunpack.c.l.b16 %v985_v18  ;;  %v2783_v33 = vrot.slane %v1154_v4, 11  ;;  %v1444_v18 = vld [vmem:[#allocation2 + $0x2c] sm:$0x1]  ;;  %v2819_v14 = vrot.slane %v1442_v11, 9 }
 0x123   :  { %v988_v16 = vsel %vm3444_vm5, %v986_v12, %v987_v61  ;;  %v1155_v61 = vld [vmem:[#allocation2 + $0x24] sm:$0xf]  ;;  %v1495_v15 = vrot.slane %v1493_v10, 4 }
 0x124   :  { %v996_v21 = vunpack.c.l.b16 %v988_v16  ;;  %914 = vmatmul.bf16.gmra.mxu0 %v838_v19  ;;  %v1331_v1 = vrot.slane %v1155_v61, 7  ;;  %v1496_v16 = vrot.slane %v1444_v18, 5  ;;  %v3216_v18 = vld [vmem:[#allocation3 + $0x8] sm:$0xff] }
 0x126   :  { %v1000_v27 = vpack.c.b16 %v996_v21, %v995_v20  ;;  %v3120_v55 = vld [vmem:[#allocation2 + $0x34] sm:$0xff]  ;;  %v1333_v7 = vrot.slane %v1331_v1, 4  ;;  %v1332_v12 = vsel %vm3424_vm2, %v2783_v33, %v1331_v1  ;;  %v1494_v21 = vsel %vm3444_vm5, %v2819_v14, %v1493_v10  ;;  %v3215_v1 = vld [vmem:[#allocation3] sm:$0xff] }
 0x127   :  { %v1347_v17 = vunpack.c.l.b16 %v1332_v12  ;;  %v1158_v20 = vld [vmem:[#allocation2 + $0x34] sm:$0xf]  ;;  %v1497_v22 = vsel %vm3444_vm5, %v1495_v15, %v1496_v16  ;;  %v1509_v26 = vunpack.c.l.b16 %v1494_v21  ;;  %v1159_v29 = vld [vmem:[#allocation2 + $0x38] sm:$0x7] }
 0x128   :  { %1076 = vmatmul.bf16.gmra.mxu1 %v1000_v27  ;;  %v1335_v13 = vsel %vm3424_vm2, %v1333_v7, %v1334_v8  ;;  %v1338_v24 = vrot.slane %v1158_v20, 7  ;;  %v1510_v27 = vunpack.c.l.b16 %v1497_v22  ;;  %v1446_v31 = vld [vmem:[#allocation2 + $0x38] sm:$0xf]  ;;  %v1341_v43 = vrot.slane %v1159_v29, 7 }
 0x129   :  { %1297 = vmatmul.bf16.gmra.mxu2 %v3120_v55  ;;  %v1348_v19 = vunpack.c.l.b16 %v1335_v13  ;;  %v1500_v36 = vrot.slane %v1446_v31, 5  ;;  %v3156_v16 = vld [vmem:[#allocation8 + $0x2b8] sm:$0xff] }
 0x12a   :  { %v1340_v34 = vrot.slane %v1338_v24, 4  ;;  %v1515_v35 = vpack.c.b16 %v1510_v27, %v1509_v26  ;;  %v1339_v40 = vsel %vm3424_vm2, %v2784_v32, %v1338_v24  ;;  %1782 = vmatpush.bf16.msra.mxu1 %v3156_v16 }
 0x12b   :  { %v1353_v23 = vpack.c.b16 %v1348_v19, %v1347_v17  ;;  %v1502_v42 = vrot.slane %v1500_v36, 4  ;;  %v1349_v44 = vunpack.c.l.b16 %v1339_v40  ;;  %v1501_v46 = vsel %vm3444_vm5, %v2820_v25, %v1500_v36  ;;  %v3143_v17 = vld [vmem:[#allocation8 + $0x270] sm:$0xff] }
 0x12c   :  { %v1342_v41 = vsel %vm3424_vm2, %v1340_v34, %v1341_v43  ;;  %v1511_v49 = vunpack.c.l.b16 %v1501_v46  ;;  %v3163_v19 = vld [vmem:[#allocation8 + $0x2f0] sm:$0xff]  ;;  %1916 = vmatpush.bf16.msrb.mxu2 %v3143_v17  ;;  %v3218_v46 = vld [vmem:[#allocation3 + $0x18] sm:$0xff] }
 0x12d   :  { %v1350_v45 = vunpack.c.l.b16 %v1342_v41  ;;  %2078 = vmatpush.bf16.msrb.mxu3 %v3163_v19  ;;  %v3217_v34 = vld [vmem:[#allocation3 + $0x10] sm:$0xff] }
 0x12e   :  { %1415 = vmatmul.bf16.vlgmr.msra.gmra.mxu3 %v1351_v39  ;;  %v1447_v39 = vld [vmem:[#allocation2 + $0x3c] sm:$0x1]  ;;  %v3155_v36 = vld [vmem:[#allocation8 + $0x2b0] sm:$0xff] }
 0x12f   :  { %v1503_v50 = vrot.slane %v1447_v39, 5  ;;  %v3162_v39 = vld [vmem:[#allocation8 + $0x2e8] sm:$0xff]  ;;  %1783 = vmatpush.bf16.msra.mxu1 %v3155_v36  ;;  %v3149_v36 = vld [vmem:[#allocation8 + $0x280] sm:$0xff] }
 0x130   :  { %1917 = vmatpush.bf16.msrb.mxu2 %v3142_v38 }
 0x131   :  { %v1504_v47 = vsel %vm3444_vm5, %v1502_v42, %v1503_v50  ;;  %2079 = vmatpush.bf16.msrb.mxu3 %v3162_v39 }
 0x132   :  { %v1512_v51 = vunpack.c.l.b16 %v1504_v47 }
 0x134   :  { %1577 = vmatmul.bf16.vlgmr.msra.gmra.mxu0 %v1513_v48  ;;  %v1354_v48 = vpack.c.b16 %v1350_v45, %v1349_v44  ;;  %v1516_v52 = vpack.c.b16 %v1512_v51, %v1511_v49  ;;  %v3154_v51 = vld [vmem:[#allocation8 + $0x2a8] sm:$0xff] }
 0x135   :  { %1784 = vmatpush.bf16.msra.mxu1 %v3154_v51 }
 0x13e   :  { %1420 = vmatmul.bf16.gmra.mxu3 %v1352_v0 }
 0x144   :  { %1582 = vmatmul.bf16.gmra.mxu0 %v1514_v9 }
 0x14e   :  { %1425 = vmatmul.bf16.gmra.mxu3 %v1353_v23 }
 0x154   :  { %1587 = vmatmul.bf16.gmra.mxu0 %v1515_v35 }
 0x15e   :  { %1430 = vmatmul.bf16.gmra.mxu3 %v1354_v48 }
 0x164   :  { %1592 = vmatmul.bf16.gmra.mxu0 %v1516_v52  ;;  %v3141_v52 = vld [vmem:[#allocation8 + $0x260] sm:$0xff] }
 0x165   :  { %1918 = vmatpush.bf16.msrb.mxu2 %v3141_v52 }
 0x169   :  { %1919 = vmatpush.bf16.msrb.mxu2 %v3140_v6 }
 0x171   :  { %v900_v53 = vpop.f32.mrf.mxu0  ;;  %v767_v54 = vpop.f32.mrf.mxu3 }
 0x172   :  { %v901_v55 = vadd.f32 %v900_v53, %v767_v54  ;;  %v3161_v53 = vld [vmem:[#allocation8 + $0x2e0] sm:$0xff] }
 0x173   :  { %2080 = vmatpush.bf16.msrb.mxu3 %v3161_v53  ;;  %v3157_v53 = vld [vmem:[#allocation8 + $0x2c0] sm:$0xff] }
 0x175   :  { %v1062_v57 = vpop.f32.mrf.mxu1 }
 0x176   :  { %v1082_v58 = vadd.f32 %v1062_v57, %v901_v55 }
 0x178   :  { %v1092_v59 = vadd.f32 %v3556_v56, %v1082_v58 }
 0x179   :  { %v902_v61 = vpop.f32.mrf.mxu0  ;;  %v769_v62 = vpop.f32.mrf.mxu3 }
 0x17a   :  { %vm1100_vm14 = vcmp.ge.f32.partialorder %v1092_v59, 0.0  ;;  %v1108_v60 = vmul.f32 0.01, %v1092_v59  ;;  %v903_v0 = vadd.f32 %v902_v61, %v769_v62  ;;  %v3153_v62 = vld [vmem:[#allocation8 + $0x2a0] sm:$0xff] }
 0x17b   :  { %1785 = vmatpush.bf16.msra.mxu1 %v3153_v62 }
 0x17c   :  { %v1116_v63 = vsel %vm1100_vm14, %v1092_v59, %v1108_v60 }
 0x17d   :  { %v1124_v2 = vadd.f32 %v3215_v1, %v1116_v63  ;;  %v1064_v3 = vpop.f32.mrf.mxu1 }
 0x17e   :  { %v1083_v4 = vadd.f32 %v1064_v3, %v903_v0 }
 0x17f   :  { %2439 = vst [vmem:[#allocation9] sm:$0xff] %v1124_v2  ;;  %v2156_v14 = vpack.c.bf16 %v1124_v2, %v1124_v2  ;;  %v3219_v2 = vld [vmem:[#allocation3 + $0x20] sm:$0xff] }
 0x180   :  { %v1093_v33 = vadd.f32 %v3556_v56, %v1083_v4 }
 0x181   :  { %v905_v8 = vpop.f32.mrf.mxu0  ;;  %v772_v9 = vpop.f32.mrf.mxu3  ;;  %v3561_v22 = vunpack.c.l.b16 %v2156_v14 }
 0x182   :  { %vm1101_vm15 = vcmp.ge.f32.partialorder %v1093_v33, 0.0  ;;  %v1109_v7 = vmul.f32 0.01, %v1093_v33  ;;  %v906_v11 = vadd.f32 %v905_v8, %v772_v9  ;;  %v1283_v14 = vpop.f32.mrf.mxu2 }
 0x184   :  { %v1117_v10 = vsel %vm1101_vm15, %v1093_v33, %v1109_v7  ;;  %v3160_v33 = vld [vmem:[#allocation8 + $0x2d8] sm:$0xff] }
 0x185   :  { %v1125_v12 = vadd.f32 %v3216_v18, %v1117_v10  ;;  %v1067_v13 = vpop.f32.mrf.mxu1  ;;  %v3152_v7 = vld [vmem:[#allocation8 + $0x298] sm:$0xff]  ;;  %2081 = vmatpush.bf16.msrb.mxu3 %v3160_v33  ;;  %v3151_v18 = vld [vmem:[#allocation8 + $0x290] sm:$0xff] }
 0x186   :  { %v1084_v15 = vadd.f32 %v1067_v13, %v906_v11  ;;  %1786 = vmatpush.bf16.msra.mxu1 %v3152_v7 }
 0x187   :  { %2440 = vst [vmem:[#allocation9 + $0x8] sm:$0xff] %v1125_v12  ;;  %v2157_v20 = vpack.c.bf16 %v1125_v12, %v1125_v12 }
 0x188   :  { %v1094_v21 = vadd.f32 %v3556_v56, %v1084_v15  ;;  %v3220_v15 = vld [vmem:[#allocation3 + $0x28] sm:$0xff] }
 0x189   :  { %v3563_v23 = vunpack.c.l.b16 %v2157_v20  ;;  %v907_v26 = vpop.f32.mrf.mxu0  ;;  %v774_v27 = vpop.f32.mrf.mxu3 }
 0x18a   :  { %vm1102_vm0 = vcmp.ge.f32.partialorder %v1094_v21, 0.0  ;;  %v1110_v24 = vmul.f32 0.01, %v1094_v21  ;;  %v908_v29 = vadd.f32 %v907_v26, %v774_v27  ;;  %1787 = vmatpush.bf16.msra.mxu1 %v3151_v18  ;;  %v3150_v26 = vld [vmem:[#allocation8 + $0x288] sm:$0xff] }
 0x18b   :  { %v2322_v28 = vpack.c.b16 %v3563_v23, %v3561_v22  ;;  %v3177_v22 = vld [vmem:[%s3769_s5 + $0x60] sm:$0xff]  ;;  %v3176_v23 = vld [vmem:[%s3769_s5 + $0x58] sm:$0xff] }
 0x18c   :  { %v1118_v31 = vsel %vm1102_vm0, %v1094_v21, %v1110_v24  ;;  %v3139_v21 = vld [vmem:[#allocation8 + $0x250] sm:$0xff] }
 0x18d   :  { %v1069_v32 = vpop.f32.mrf.mxu1  ;;  %v1126_v43 = vadd.f32 %v3217_v34, %v1118_v31  ;;  %v3159_v24 = vld [vmem:[#allocation8 + $0x2d0] sm:$0xff]  ;;  %1920 = vmatpush.bf16.msrb.mxu2 %v3139_v21 }
 0x18e   :  { %v1085_v35 = vadd.f32 %v1069_v32, %v908_v29  ;;  %2082 = vmatpush.bf16.msrb.mxu3 %v3159_v24  ;;  %1788 = vmatpush.bf16.msra.mxu1 %v3150_v26  ;;  %v1656_v24 = vld [vmem:[#allocation2] sm:$0x8] }
 0x18f   :  { %2441 = vst [vmem:[#allocation9 + $0x10] sm:$0xff] %v1126_v43  ;;  %v2158_v48 = vpack.c.bf16 %v1126_v43, %v1126_v43 }
 0x190   :  { %v1095_v40 = vadd.f32 %v3556_v56, %v1085_v35 }
 0x191   :  { %v910_v25 = vpop.f32.mrf.mxu0  ;;  %v777_v42 = vpop.f32.mrf.mxu3  ;;  %v3569_v57 = vunpack.c.l.b16 %v2158_v48  ;;  %v3137_v48 = vld [vmem:[#allocation8 + $0x240] sm:$0xff] }
 0x192   :  { %vm1103_vm1 = vcmp.ge.f32.partialorder %v1095_v40, 0.0  ;;  %v1111_v41 = vmul.f32 0.01, %v1095_v40  ;;  %v911_v50 = vadd.f32 %v910_v25, %v777_v42  ;;  %1789 = vmatpush.bf16.msra.mxu1 %v3149_v36 }
 0x194   :  { %v1119_v44 = vsel %vm1103_vm1, %v1095_v40, %v1111_v41  ;;  %v3221_v41 = vld [vmem:[#allocation3 + $0x30] sm:$0xff] }
 0x195   :  { %v1072_v45 = vpop.f32.mrf.mxu1  ;;  %v1127_v47 = vadd.f32 %v3218_v46, %v1119_v44  ;;  %v3158_v46 = vld [vmem:[#allocation8 + $0x2c8] sm:$0xff] }
 0x196   :  { %v1086_v49 = vadd.f32 %v1072_v45, %v911_v50  ;;  %v3138_v50 = vld [vmem:[#allocation8 + $0x248] sm:$0xff]  ;;  %v1285_v45 = vpop.f32.mrf.mxu2  ;;  %2083 = vmatpush.bf16.msrb.mxu3 %v3158_v46 }
 0x197   :  { %v2159_v54 = vpack.c.bf16 %v1127_v47, %v1127_v47  ;;  %2442 = vst [vmem:[#allocation9 + $0x18] sm:$0xff] %v1127_v47  ;;  %1921 = vmatpush.bf16.msrb.mxu2 %v3138_v50 }
 0x198   :  { %v1096_v55 = vadd.f32 %v3556_v56, %v1086_v49 }
 0x199   :  { %v3571_v58 = vunpack.c.l.b16 %v2159_v54  ;;  %v912_v60 = vpop.f32.mrf.mxu0  ;;  %v779_v61 = vpop.f32.mrf.mxu3 }
 0x19a   :  { %vm1104_vm3 = vcmp.ge.f32.partialorder %v1096_v55, 0.0  ;;  %v1112_v59 = vmul.f32 0.01, %v1096_v55  ;;  %v913_v1 = vadd.f32 %v912_v60, %v779_v61  ;;  %v3222_v60 = vld [vmem:[#allocation3 + $0x38] sm:$0xff]  ;;  %2084 = vmatpush.bf16.msrb.mxu3 %v3157_v53 }
 0x19b   :  { %v2323_v63 = vpack.c.b16 %v3571_v58, %v3569_v57  ;;  %1922 = vmatpush.bf16.msrb.mxu2 %v3137_v48  ;;  %v3174_v57 = vld [vmem:[%s3769_s5 + $0x48] sm:$0xff] }
 0x19c   :  { %v1120_v0 = vsel %vm1104_vm3, %v1096_v55, %v1112_v59  ;;  %v3587_v59 = vld [vmem:[%s3768_s4 + $0x2] ss:$0 sm:$0xff] }
 0x19d   :  { %v1128_v3 = vadd.f32 %v3219_v2, %v1120_v0  ;;  %v1074_v4 = vpop.f32.mrf.mxu1 }
 0x19e   :  { %v1087_v5 = vadd.f32 %v1074_v4, %v913_v1  ;;  %v1288_v2 = vpop.f32.mrf.mxu2 }
 0x19f   :  { %2443 = vst [vmem:[#allocation9 + $0x20] sm:$0xff] %v1128_v3  ;;  %v2160_v19 = vpack.c.bf16 %v1128_v3, %v1128_v3 }
 0x1a0   :  { %v1097_v8 = vadd.f32 %v3556_v56, %v1087_v5 }
 0x1a1   :  { %v915_v10 = vpop.f32.mrf.mxu0  ;;  %v782_v11 = vpop.f32.mrf.mxu3  ;;  %v3577_v31 = vunpack.c.l.b16 %v2160_v19 }
 0x1a2   :  { %vm1105_vm4 = vcmp.ge.f32.partialorder %v1097_v8, 0.0  ;;  %v1113_v9 = vmul.f32 0.01, %v1097_v8  ;;  %v916_v13 = vadd.f32 %v915_v10, %v782_v11 }
 0x1a4   :  { %v1121_v12 = vsel %vm1105_vm4, %v1097_v8, %v1113_v9 }
 0x1a5   :  { %v1129_v16 = vadd.f32 %v3220_v15, %v1121_v12  ;;  %v1077_v17 = vpop.f32.mrf.mxu1 }
 0x1a6   :  { %v1088_v20 = vadd.f32 %v1077_v17, %v916_v13  ;;  %v1290_v13 = vpop.f32.mrf.mxu2 }
 0x1a7   :  { %2444 = vst [vmem:[#allocation9 + $0x28] sm:$0xff] %v1129_v16  ;;  %v2161_v27 = vpack.c.bf16 %v1129_v16, %v1129_v16 }
 0x1a8   :  { %v1098_v29 = vadd.f32 %v3556_v56, %v1088_v20 }
 0x1a9   :  { %v3579_v32 = vunpack.c.l.b16 %v2161_v27  ;;  %v917_v43 = vpop.f32.mrf.mxu0  ;;  %v784_v35 = vpop.f32.mrf.mxu3 }
 0x1aa   :  { %vm1106_vm6 = vcmp.ge.f32.partialorder %v1098_v29, 0.0  ;;  %v1114_v34 = vmul.f32 0.01, %v1098_v29  ;;  %v918_v40 = vadd.f32 %v917_v43, %v784_v35  ;;  %v2901_v35 = vrot.slane %v1656_v24, 11 }
 0x1ab   :  { %v2324_v38 = vpack.c.b16 %v3579_v32, %v3577_v31 }
 0x1ac   :  { %v1122_v39 = vsel %vm1106_vm6, %v1098_v29, %v1114_v34  ;;  %v1946_v29 = vld [vmem:[#allocation2 + $0xc] sm:$0x1] }
 0x1ad   :  { %v1130_v25 = vadd.f32 %v3221_v41, %v1122_v39  ;;  %v1079_v42 = vpop.f32.mrf.mxu1  ;;  %v1990_v50 = vrot.slane %v1946_v29, 5 }
 0x1ae   :  { %v1089_v44 = vadd.f32 %v1079_v42, %v918_v40  ;;  %v1293_v42 = vpop.f32.mrf.mxu2 }
 0x1af   :  { %2445 = vst [vmem:[#allocation9 + $0x30] sm:$0xff] %v1130_v25  ;;  %v2162_v62 = vpack.c.bf16 %v1130_v25, %v1130_v25 }
 0x1b0   :  { %v1099_v47 = vadd.f32 %v3556_v56, %v1089_v44 }
 0x1b1   :  { %v1578_v51 = vpop.f32.mrf.mxu0  ;;  %v1416_v52 = vpop.f32.mrf.mxu3  ;;  %v3590_v3 = vunpack.c.l.b16 %v2162_v62 }
 0x1b2   :  { %vm1107_vm7 = vcmp.ge.f32.partialorder %v1099_v47, 0.0  ;;  %v1115_v49 = vmul.f32 0.01, %v1099_v47  ;;  %v1417_v55 = vadd.f32 %v1416_v52, %v1283_v14 }
 0x1b4   :  { %v1123_v54 = vsel %vm1107_vm7, %v1099_v47, %v1115_v49  ;;  %v1598_v56 = vadd.f32 %v1578_v51, %v1417_v55 }
 0x1b5   :  { %v1131_v61 = vadd.f32 %v3222_v60, %v1123_v54  ;;  %v3172_v54 = vld [vmem:[%s3769_s5 + $0x38] sm:$0xff] }
 0x1b6   :  { %v1608_v1 = vadd.f32 %v3587_v59, %v1598_v56  ;;  %2378 = vmatpush.bf16.msrb.mxu1 %v3172_v54 }
 0x1b7   :  { %2446 = vst [vmem:[#allocation9 + $0x38] sm:$0xff] %v1131_v61  ;;  %v2163_v0 = vpack.c.bf16 %v1131_v61, %v1131_v61 }
 0x1b8   :  { %vm1616_vm8 = vcmp.ge.f32.partialorder %v1608_v1, 0.0  ;;  %v1624_v5 = vmul.f32 0.01, %v1608_v1 }
 0x1b9   :  { %v3592_v4 = vunpack.c.l.b16 %v2163_v0  ;;  %v1580_v6 = vpop.f32.mrf.mxu0  ;;  %v1418_v33 = vpop.f32.mrf.mxu3 }
 0x1ba   :  { %v1632_v8 = vsel %vm1616_vm8, %v1608_v1, %v1624_v5  ;;  %v1419_v9 = vadd.f32 %v1418_v33, %v1285_v45 }
 0x1bb   :  { %v2325_v7 = vpack.c.b16 %v3592_v4, %v3590_v3  ;;  %v1640_v10 = vpack.c.bf16 %v1632_v8, %v1632_v8  ;;  %v3171_v8 = vld [vmem:[%s3769_s5 + $0x30] sm:$0xff]  ;;  %v3698_v3 = vld [vmem:[%s3768_s4 + $0x3] ss:$0 sm:$0xff]  ;;  %s3367_s4 = smov [#allocation9]  }
 0x1bc   :  { %v1599_v11 = vadd.f32 %v1580_v6, %v1419_v9  ;;  %2379 = vmatpush.bf16.msrb.mxu1 %v3171_v8 }
 0x1bd   :  { %1648 = vst [vmem:[#allocation2 + $0x4] sm:$0xf] %v1640_v10 }
 0x1be   :  { %v1609_v18 = vadd.f32 %v3587_v59, %v1599_v11 }
 0x1c0   :  { %vm1617_vm9 = vcmp.ge.f32.partialorder %v1609_v18, 0.0  ;;  %v1625_v12 = vmul.f32 0.01, %v1609_v18 }
 0x1c1   :  { %v1583_v14 = vpop.f32.mrf.mxu0  ;;  %v1421_v15 = vpop.f32.mrf.mxu3 }
 0x1c2   :  { %v1633_v16 = vsel %vm1617_vm9, %v1609_v18, %v1625_v12  ;;  %v1422_v17 = vadd.f32 %v1421_v15, %v1288_v2  ;;  %v1295_v15 = vpop.f32.mrf.mxu2 }
 0x1c3   :  { %v1641_v19 = vpack.c.bf16 %v1633_v16, %v1633_v16  ;;  %v3170_v16 = vld [vmem:[%s3769_s5 + $0x28] sm:$0xff] }
 0x1c4   :  { %v1600_v20 = vadd.f32 %v1583_v14, %v1422_v17  ;;  %v1657_v26 = vld [vmem:[#allocation2 + $0x4] sm:$0xf]  ;;  %2380 = vmatpush.bf16.msrb.mxu1 %v3170_v16 }
 0x1c5   :  { %1649 = vst [vmem:[#allocation2 + $0x8] sm:$0xf] %v1641_v19  ;;  %v1825_v36 = vrot.slane %v1657_v26, 7  ;;  %v1944_v39 = vld [vmem:[#allocation2 + $0x4] sm:$0xe] }
 0x1c6   :  { %v1610_v21 = vadd.f32 %v3587_v59, %v1600_v20  ;;  %v2937_v48 = vrot.slane %v1944_v39, 9  ;;  %v1659_v19 = vld [vmem:[#allocation2 + $0x10] sm:$0x8]  ;;  %v1949_v26 = vld [vmem:[#allocation2 + $0x1c] sm:$0x1] }
 0x1c7   :  { %v1826_v49 = vsel %vm3424_vm2, %v2901_v35, %v1825_v36  ;;  %v1827_v51 = vrot.slane %v1825_v36, 4 }
 0x1c8   :  { %vm1618_vm10 = vcmp.ge.f32.partialorder %v1610_v21, 0.0  ;;  %v1626_v27 = vmul.f32 0.01, %v1610_v21  ;;  %v1851_v0 = vunpack.c.l.b16 %v1826_v49 }
 0x1c9   :  { %v1585_v34 = vpop.f32.mrf.mxu0  ;;  %v1423_v43 = vpop.f32.mrf.mxu3 }
 0x1ca   :  { %v1634_v40 = vsel %vm1618_vm10, %v1610_v21, %v1626_v27  ;;  %v1424_v41 = vadd.f32 %v1423_v43, %v1290_v13  ;;  %v3169_v21 = vld [vmem:[%s3769_s5 + $0x20] sm:$0xff] }
 0x1cb   :  { %v1642_v25 = vpack.c.bf16 %v1634_v40, %v1634_v40  ;;  %2381 = vmatpush.bf16.msrb.mxu1 %v3169_v21 }
 0x1cc   :  { %v1601_v44 = vadd.f32 %v1585_v34, %v1424_v41  ;;  %v3145_v45 = vld [vmem:[#allocation2 + $0x4] sm:$0xff]  ;;  %v2902_v34 = vrot.slane %v1659_v19, 11  ;;  %v1997_v41 = vrot.slane %v1949_v26, 5 }
 0x1cd   :  { %v1658_v46 = vld [vmem:[#allocation2 + $0x8] sm:$0x7]  ;;  %1650 = vst [vmem:[#allocation2 + $0x14] sm:$0xf] %v1642_v25  ;;  %1790 = vmatmul.bf16.vlgmr.msra.gmra.mxu1 %v3145_v45 }
 0x1ce   :  { %v1945_v47 = vld [vmem:[#allocation2 + $0x8] sm:$0xf]  ;;  %v1828_v52 = vrot.slane %v1658_v46, 7  ;;  %v1611_v55 = vadd.f32 %v3587_v59, %v1601_v44 }
 0x1cf   :  { %v1987_v53 = vrot.slane %v1945_v47, 5 }
 0x1d0   :  { %v1829_v60 = vsel %vm3424_vm2, %v1827_v51, %v1828_v52  ;;  %vm1619_vm11 = vcmp.ge.f32.partialorder %v1611_v55, 0.0  ;;  %v1627_v56 = vmul.f32 0.01, %v1611_v55  ;;  %v3168_v51 = vld [vmem:[%s3769_s5 + $0x18] sm:$0xff] }
 0x1d1   :  { %v1988_v61 = vsel %vm3444_vm5, %v2937_v48, %v1987_v53  ;;  %v1989_v62 = vrot.slane %v1987_v53, 4  ;;  %v1852_v1 = vunpack.c.l.b16 %v1829_v60  ;;  %v1588_v2 = vpop.f32.mrf.mxu0  ;;  %v1426_v5 = vpop.f32.mrf.mxu3  ;;  %2382 = vmatpush.bf16.msrb.mxu1 %v3168_v51 }
 0x1d2   :  { %v2013_v33 = vunpack.c.l.b16 %v1988_v61  ;;  %v1635_v9 = vsel %vm1619_vm11, %v1611_v55, %v1627_v56  ;;  %v1427_v10 = vadd.f32 %v1426_v5, %v1293_v42  ;;  %v1298_v53 = vpop.f32.mrf.mxu2 }
 0x1d3   :  { %v1991_v6 = vsel %vm3444_vm5, %v1989_v62, %v1990_v50  ;;  %v1859_v11 = vpack.c.b16 %v1852_v1, %v1851_v0  ;;  %v1643_v12 = vpack.c.bf16 %v1635_v9, %v1635_v9 }
 0x1d4   :  { %v2014_v18 = vunpack.c.l.b16 %v1991_v6  ;;  %v1602_v13 = vadd.f32 %v1588_v2, %v1427_v10  ;;  %v1660_v20 = vld [vmem:[#allocation2 + $0x14] sm:$0xf] }
 0x1d5   :  { %1923 = vmatmul.bf16.vlgmr.msrb.gmra.mxu2 %v1859_v11  ;;  %1651 = vst [vmem:[#allocation2 + $0x18] sm:$0xf] %v1643_v12  ;;  %v1832_v43 = vrot.slane %v1660_v20, 7  ;;  %v1947_v35 = vld [vmem:[#allocation2 + $0x14] sm:$0xe] }
 0x1d6   :  { %v2021_v14 = vpack.c.b16 %v2014_v18, %v2013_v33  ;;  %v1612_v17 = vadd.f32 %v3587_v59, %v1602_v13  ;;  %v2938_v45 = vrot.slane %v1947_v35, 9  ;;  %v3167_v6 = vld [vmem:[%s3769_s5 + $0x10] sm:$0xff]  ;;  %v3166_v13 = vld [vmem:[%s3769_s5 + $0x8] sm:$0xff] }
 0x1d7   :  { %v1833_v46 = vsel %vm3424_vm2, %v2902_v34, %v1832_v43  ;;  %v1834_v47 = vrot.slane %v1832_v43, 4  ;;  %2383 = vmatpush.bf16.msrb.mxu1 %v3167_v6  ;;  %v1952_v20 = vld [vmem:[#allocation2 + $0x2c] sm:$0x1]  ;;  %v1955_v6 = vld [vmem:[#allocation2 + $0x3c] sm:$0x1] }
 0x1d8   :  { %2085 = vmatmul.bf16.vlgmr.msrb.gmra.mxu3 %v2021_v14  ;;  %vm1620_vm12 = vcmp.ge.f32.partialorder %v1612_v17, 0.0  ;;  %v1628_v24 = vmul.f32 0.01, %v1612_v17  ;;  %v1853_v62 = vunpack.c.l.b16 %v1833_v46 }
 0x1d9   :  { %v1590_v27 = vpop.f32.mrf.mxu0  ;;  %v1428_v29 = vpop.f32.mrf.mxu3 }
 0x1da   :  { %v1636_v36 = vsel %vm1620_vm12, %v1612_v17, %v1628_v24  ;;  %v1429_v39 = vadd.f32 %v1428_v29, %v1295_v15  ;;  %v1662_v15 = vld [vmem:[#allocation2 + $0x20] sm:$0x8]  ;;  %v1300_v21 = vpop.f32.mrf.mxu2 }
 0x1db   :  { %v1644_v40 = vpack.c.bf16 %v1636_v36, %v1636_v36  ;;  %2384 = vmatpush.bf16.msrb.mxu1 %v3166_v13  ;;  %v3165_v17 = vld [vmem:[%s3769_s5] sm:$0xff]  ;;  %v2903_v26 = vrot.slane %v1662_v15, 11 }
 0x1dc   :  { %v1603_v25 = vadd.f32 %v1590_v27, %v1429_v39  ;;  %v3146_v42 = vld [vmem:[#allocation2 + $0x14] sm:$0xff]  ;;  %v2004_v39 = vrot.slane %v1952_v20, 5 }
 0x1dd   :  { %v1661_v50 = vld [vmem:[#allocation2 + $0x18] sm:$0x7]  ;;  %1652 = vst [vmem:[#allocation2 + $0x24] sm:$0xf] %v1644_v40  ;;  %1795 = vmatmul.bf16.gmra.mxu1 %v3146_v42 }
 0x1de   :  { %v1948_v44 = vld [vmem:[#allocation2 + $0x18] sm:$0xf]  ;;  %v1835_v48 = vrot.slane %v1661_v50, 7  ;;  %v1613_v52 = vadd.f32 %v3587_v59, %v1603_v25 }
 0x1df   :  { %v1994_v49 = vrot.slane %v1948_v44, 5  ;;  %2385 = vmatpush.bf16.msrb.mxu1 %v3165_v17 }
 0x1e0   :  { %v1836_v54 = vsel %vm3424_vm2, %v1834_v47, %v1835_v48  ;;  %vm1621_vm13 = vcmp.ge.f32.partialorder %v1613_v52, 0.0  ;;  %v1629_v61 = vmul.f32 0.01, %v1613_v52 }
 0x1e1   :  { %v1995_v55 = vsel %vm3444_vm5, %v2938_v45, %v1994_v49  ;;  %v1996_v60 = vrot.slane %v1994_v49, 4  ;;  %v1854_v56 = vunpack.c.l.b16 %v1836_v54  ;;  %v1593_v0 = vpop.f32.mrf.mxu0  ;;  %v1431_v1 = vpop.f32.mrf.mxu3 }
 0x1e2   :  { %v2015_v5 = vunpack.c.l.b16 %v1995_v55  ;;  %v1637_v33 = vsel %vm1621_vm13, %v1613_v52, %v1629_v61  ;;  %v1432_v8 = vadd.f32 %v1431_v1, %v1298_v53 }
 0x1e3   :  { %v1998_v2 = vsel %vm3444_vm5, %v1996_v60, %v1997_v41  ;;  %v1860_v9 = vpack.c.b16 %v1854_v56, %v1853_v62  ;;  %v1645_v11 = vpack.c.bf16 %v1637_v33, %v1637_v33 }
 0x1e4   :  { %v2016_v10 = vunpack.c.l.b16 %v1998_v2  ;;  %v1604_v18 = vadd.f32 %v1593_v0, %v1432_v8  ;;  %v1663_v16 = vld [vmem:[#allocation2 + $0x24] sm:$0xf]  ;;  %v1665_v2 = vld [vmem:[#allocation2 + $0x30] sm:$0x8] }
 0x1e5   :  { %1928 = vmatmul.bf16.gmra.mxu2 %v1860_v9  ;;  %1653 = vst [vmem:[#allocation2 + $0x28] sm:$0xf] %v1645_v11  ;;  %v1839_v27 = vrot.slane %v1663_v16, 7  ;;  %v1950_v29 = vld [vmem:[#allocation2 + $0x24] sm:$0xe]  ;;  %v2904_v33 = vrot.slane %v1665_v2, 11 }
 0x1e6   :  { %v2022_v12 = vpack.c.b16 %v2016_v10, %v2015_v5  ;;  %v1614_v14 = vadd.f32 %v3587_v59, %v1604_v18  ;;  %v2939_v50 = vrot.slane %v1950_v29, 9  ;;  %v2011_v10 = vrot.slane %v1955_v6, 5 }
 0x1e7   :  { %v1840_v44 = vsel %vm3424_vm2, %v2903_v26, %v1839_v27  ;;  %v1841_v45 = vrot.slane %v1839_v27, 4 }
 0x1e8   :  { %2090 = vmatmul.bf16.gmra.mxu3 %v2022_v12  ;;  %vm1622_vm14 = vcmp.ge.f32.partialorder %v1614_v14, 0.0  ;;  %v1630_v19 = vmul.f32 0.01, %v1614_v14  ;;  %v1855_v54 = vunpack.c.l.b16 %v1840_v44 }
 0x1e9   :  { %v1433_v24 = vpop.f32.mrf.mxu3  ;;  %v1595_v36 = vpop.f32.mrf.mxu0 }
 0x1ea   :  { %v1638_v34 = vsel %vm1622_vm14, %v1614_v14, %v1630_v19  ;;  %v1434_v43 = vadd.f32 %v1433_v24, %v1300_v21 }
 0x1eb   :  { %v1646_v35 = vpack.c.bf16 %v1638_v34, %v1638_v34 }
 0x1ec   :  { %v1605_v40 = vadd.f32 %v1595_v36, %v1434_v43  ;;  %v3147_v41 = vld [vmem:[#allocation2 + $0x24] sm:$0xff] }
 0x1ed   :  { %v1664_v25 = vld [vmem:[#allocation2 + $0x28] sm:$0x7]  ;;  %1654 = vst [vmem:[#allocation2 + $0x34] sm:$0xf] %v1646_v35  ;;  %1800 = vmatmul.bf16.gmra.mxu1 %v3147_v41 }
 0x1ee   :  { %v1951_v42 = vld [vmem:[#allocation2 + $0x28] sm:$0xf]  ;;  %v1842_v46 = vrot.slane %v1664_v25, 7  ;;  %v1615_v48 = vadd.f32 %v3587_v59, %v1605_v40 }
 0x1ef   :  { %v2001_v47 = vrot.slane %v1951_v42, 5  ;;  %v3178_v36 = vld [vmem:[%s3769_s5 + $0x68] sm:$0xff] }
 0x1f0   :  { %v1843_v49 = vsel %vm3424_vm2, %v1841_v45, %v1842_v46  ;;  %vm1623_vm15 = vcmp.ge.f32.partialorder %v1615_v48, 0.0  ;;  %v1631_v53 = vmul.f32 0.01, %v1615_v48  ;;  %2279 = vmatpush.bf16.msrb.mxu0 %v3178_v36 }
 0x1f1   :  { %v2002_v51 = vsel %vm3444_vm5, %v2939_v50, %v2001_v47  ;;  %v2003_v52 = vrot.slane %v2001_v47, 4  ;;  %v1856_v55 = vunpack.c.l.b16 %v1843_v49  ;;  %v3702_v47 = vld [vmem:[#allocation6] sm:$0xff] }
 0x1f2   :  { %v1639_v61 = vsel %vm1623_vm15, %v1615_v48, %v1631_v53  ;;  %v2017_v56 = vunpack.c.l.b16 %v2002_v51 }
 0x1f3   :  { %v2005_v60 = vsel %vm3444_vm5, %v2003_v52, %v2004_v39  ;;  %v1861_v62 = vpack.c.b16 %v1856_v55, %v1855_v54  ;;  %v1647_v59 = vpack.c.bf16 %v1639_v61, %v1639_v61 }
 0x1f4   :  { %v2018_v0 = vunpack.c.l.b16 %v2005_v60  ;;  %v1666_v5 = vld [vmem:[#allocation2 + $0x34] sm:$0xf]  ;;  %2280 = vmatpush.bf16.msrb.mxu0 %v3177_v22  ;;  %v3705_v60 = vld [vmem:[#allocation6 + $0x8] sm:$0xff] }
 0x1f5   :  { %1933 = vmatmul.bf16.gmra.mxu2 %v1861_v62  ;;  %1655 = vst [vmem:[#allocation2 + $0x38] sm:$0xf] %v1647_v59  ;;  %v1846_v8 = vrot.slane %v1666_v5, 7  ;;  %v1953_v9 = vld [vmem:[#allocation2 + $0x34] sm:$0xe] }
 0x1f6   :  { %v2023_v1 = vpack.c.b16 %v2018_v0, %v2017_v56  ;;  %v2940_v13 = vrot.slane %v1953_v9, 9 }
 0x1f7   :  { %v1847_v14 = vsel %vm3424_vm2, %v2904_v33, %v1846_v8  ;;  %v1848_v15 = vrot.slane %v1846_v8, 4 }
 0x1f8   :  { %2095 = vmatmul.bf16.gmra.mxu3 %v2023_v1  ;;  %v1857_v24 = vunpack.c.l.b16 %v1847_v14  ;;  %2281 = vmatpush.bf16.msrb.mxu0 %v3176_v23 }
 0x1fc   :  { %v3148_v11 = vld [vmem:[#allocation2 + $0x34] sm:$0xff] }
 0x1fd   :  { %v1667_v18 = vld [vmem:[#allocation2 + $0x38] sm:$0x7]  ;;  %1805 = vmatmul.bf16.gmra.mxu1 %v3148_v11 }
 0x1fe   :  { %v1954_v12 = vld [vmem:[#allocation2 + $0x38] sm:$0xf]  ;;  %v1849_v16 = vrot.slane %v1667_v18, 7 }
 0x1ff   :  { %v2008_v17 = vrot.slane %v1954_v12, 5 }
 0x200   :  { %v1850_v19 = vsel %vm3424_vm2, %v1848_v15, %v1849_v16 }
 0x201   :  { %v2009_v20 = vsel %vm3444_vm5, %v2940_v13, %v2008_v17  ;;  %v2010_v21 = vrot.slane %v2008_v17, 4  ;;  %v1858_v26 = vunpack.c.l.b16 %v1850_v19  ;;  %v3710_v13 = vld [vmem:[#allocation6 + $0x10] sm:$0xff] }
 0x202   :  { %v2019_v34 = vunpack.c.l.b16 %v2009_v20 }
 0x203   :  { %v2012_v27 = vsel %vm3444_vm5, %v2010_v21, %v2011_v10  ;;  %v1862_v29 = vpack.c.b16 %v1858_v26, %v1857_v24  ;;  %v3713_v21 = vld [vmem:[#allocation6 + $0x18] sm:$0xff] }
 0x204   :  { %v2020_v43 = vunpack.c.l.b16 %v2012_v27 }
 0x205   :  { %1938 = vmatmul.bf16.gmra.mxu2 %v1862_v29 }
 0x206   :  { %v2024_v35 = vpack.c.b16 %v2020_v43, %v2019_v34 }
 0x208   :  { %2100 = vmatmul.bf16.gmra.mxu3 %v2024_v35 }
 0x20d   :  { %2386 = vmatmul.bf16.vlgmr.msrb.gmra.mxu1 %v2322_v28  ;;  %v3175_v28 = vld [vmem:[%s3769_s5 + $0x50] sm:$0xff] }
 0x20e   :  { %2282 = vmatpush.bf16.msrb.mxu0 %v3175_v28 }
 0x212   :  { %2283 = vmatpush.bf16.msrb.mxu0 %v3174_v57 }
 0x21d   :  { %2391 = vmatmul.bf16.gmra.mxu1 %v2323_v63  ;;  %v3173_v63 = vld [vmem:[%s3769_s5 + $0x40] sm:$0xff]  ;;  %s2459_s5 = sshll.u32 %s3367_s4, 4  ;;  %s2460_s5 = int_to_ptr.vmem [resolvable:$true] %s2459_s5 }
 0x21e   :  { %2284 = vmatpush.bf16.msrb.mxu0 %v3173_v63  ;;  %2467 = dma.vmem_to_hbm [thread:$0]  %s2460_s5, 1024, %s2462_s14, [#allocation5], %s3360_s9, %s3360_s9, %s3361_s10  }
 0x22d   :  { %2396 = vmatmul.bf16.gmra.mxu1 %v2324_v38 }
 0x23d   :  { %2401 = vmatmul.bf16.gmra.mxu1 %v2325_v7 }
 0x24a   :  { %v1791_v58 = vpop.f32.mrf.mxu1 }
 0x252   :  { %v1793_v31 = vpop.f32.mrf.mxu1 }
 0x258   :  { %v1924_v32 = vpop.f32.mrf.mxu2 }
 0x259   :  { %v1925_v38 = vadd.f32 %v1924_v32, %v1791_v58  ;;  %v3718_v32 = vld [vmem:[#allocation6 + $0x20] sm:$0xff] }
 0x25a   :  { %v1796_v40 = vpop.f32.mrf.mxu1 }
 0x25b   :  { %v2086_v4 = vpop.f32.mrf.mxu3 }
 0x25c   :  { %v2106_v7 = vadd.f32 %v2086_v4, %v1925_v38 }
 0x25e   :  { %v2116_v39 = vadd.f32 %v3698_v3, %v2106_v7 }
 0x260   :  { %v2132_v41 = vmul.f32 0.01, %v2116_v39  ;;  %vm2124_vm2 = vcmp.ge.f32.partialorder %v2116_v39, 0.0  ;;  %v1926_v25 = vpop.f32.mrf.mxu2 }
 0x261   :  { %v1927_v42 = vadd.f32 %v1926_v25, %v1793_v31  ;;  %v3721_v25 = vld [vmem:[#allocation6 + $0x28] sm:$0xff] }
 0x262   :  { %v2140_v44 = vsel %vm2124_vm2, %v2116_v39, %v2132_v41  ;;  %v1798_v51 = vpop.f32.mrf.mxu1 }
 0x263   :  { %v2088_v50 = vpop.f32.mrf.mxu3  ;;  %v2148_v48 = vadd.f32 %v3702_v47, %v2140_v44 }
 0x264   :  { %v2107_v45 = vadd.f32 %v2088_v50, %v1927_v42 }
 0x265   :  { %v2180_v55 = vpack.c.bf16 %v2148_v48, %v2148_v48 }
 0x266   :  { %v2117_v46 = vadd.f32 %v3698_v3, %v2107_v45 }
 0x267   :  { %v2213_v1 = vunpack.c.l.b16 %v2180_v55 }
 0x268   :  { %vm2125_vm5 = vcmp.ge.f32.partialorder %v2117_v46, 0.0  ;;  %v2133_v49 = vmul.f32 0.01, %v2117_v46  ;;  %v1929_v52 = vpop.f32.mrf.mxu2 }
 0x269   :  { %v1930_v54 = vadd.f32 %v1929_v52, %v1796_v40 }
 0x26a   :  { %v2141_v53 = vsel %vm2125_vm5, %v2117_v46, %v2133_v49  ;;  %v1801_v9 = vpop.f32.mrf.mxu1 }
 0x26b   :  { %v2149_v61 = vadd.f32 %v3705_v60, %v2141_v53  ;;  %v2091_v62 = vpop.f32.mrf.mxu3 }
 0x26c   :  { %v2108_v56 = vadd.f32 %v2091_v62, %v1930_v54 }
 0x26d   :  { %v2181_v0 = vpack.c.bf16 %v2149_v61, %v2149_v61 }
 0x26e   :  { %v2118_v59 = vadd.f32 %v3698_v3, %v2108_v56 }
 0x26f   :  { %v2214_v2 = vunpack.c.l.b16 %v2181_v0 }
 0x270   :  { %v2134_v5 = vmul.f32 0.01, %v2118_v59  ;;  %vm2126_vm0 = vcmp.ge.f32.partialorder %v2118_v59, 0.0  ;;  %v1931_v6 = vpop.f32.mrf.mxu2 }
 0x271   :  { %v2221_v33 = vpack.c.b16 %v2214_v2, %v2213_v1  ;;  %v1932_v8 = vadd.f32 %v1931_v6, %v1798_v51  ;;  %v3729_v6 = vld [vmem:[#allocation6 + $0x38] sm:$0xff] }
 0x272   :  { %v2142_v18 = vsel %vm2126_vm0, %v2118_v59, %v2134_v5  ;;  %v1803_v29 = vpop.f32.mrf.mxu1  ;;  %v3726_v59 = vld [vmem:[#allocation6 + $0x30] sm:$0xff] }
 0x273   :  { %v2093_v10 = vpop.f32.mrf.mxu3  ;;  %2285 = vmatmul.bf16.vlgmr.msrb.gmra.mxu0 %v2221_v33  ;;  %v2150_v14 = vadd.f32 %v3710_v13, %v2142_v18 }
 0x274   :  { %v2109_v11 = vadd.f32 %v2093_v10, %v1932_v8 }
 0x275   :  { %v2182_v26 = vpack.c.bf16 %v2150_v14, %v2150_v14  ;;  %v3211_v14 = vld [vmem:[%s3764_s0] ss:$0 sm:$0xff] }
 0x276   :  { %v2119_v12 = vadd.f32 %v3698_v3, %v2109_v11 }
 0x277   :  { %v2215_v35 = vunpack.c.l.b16 %v2182_v26 }
 0x278   :  { %vm2127_vm1 = vcmp.ge.f32.partialorder %v2119_v12, 0.0  ;;  %v2135_v15 = vmul.f32 0.01, %v2119_v12  ;;  %v1934_v16 = vpop.f32.mrf.mxu2 }
 0x279   :  { %v1935_v17 = vadd.f32 %v1934_v16, %v1801_v9 }
 0x27a   :  { %v2143_v19 = vsel %vm2127_vm1, %v2119_v12, %v2135_v15  ;;  %v1806_v31 = vpop.f32.mrf.mxu1 }
 0x27b   :  { %v2096_v20 = vpop.f32.mrf.mxu3  ;;  %v2151_v24 = vadd.f32 %v3713_v21, %v2143_v19 }
 0x27c   :  { %v2110_v27 = vadd.f32 %v2096_v20, %v1935_v17 }
 0x27d   :  { %v2183_v34 = vpack.c.bf16 %v2151_v24, %v2151_v24 }
 0x27e   :  { %v2120_v43 = vadd.f32 %v3698_v3, %v2110_v27 }
 0x27f   :  { %v2216_v30 = vunpack.c.l.b16 %v2183_v34  ;;  %v3212_v34 = vld [vmem:[%s3764_s0 + $0x1] ss:$0 sm:$0xff] }
 0x280   :  { %v2136_v37 = vmul.f32 0.01, %v2120_v43  ;;  %vm2128_vm3 = vcmp.ge.f32.partialorder %v2120_v43, 0.0  ;;  %v1936_v36 = vpop.f32.mrf.mxu2 }
 0x281   :  { %v2222_v22 = vpack.c.b16 %v2216_v30, %v2215_v35  ;;  %v1937_v23 = vadd.f32 %v1936_v36, %v1803_v29 }
 0x282   :  { %v2144_v57 = vsel %vm2128_vm3, %v2120_v43, %v2136_v37  ;;  %v1808_v52 = vpop.f32.mrf.mxu1 }
 0x283   :  { %v2098_v28 = vpop.f32.mrf.mxu3  ;;  %2290 = vmatmul.bf16.gmra.mxu0 %v2222_v22  ;;  %v2152_v38 = vadd.f32 %v3718_v32, %v2144_v57 }
 0x284   :  { %v2111_v58 = vadd.f32 %v2098_v28, %v1937_v23 }
 0x285   :  { %v2184_v50 = vpack.c.bf16 %v2152_v38, %v2152_v38 }
 0x286   :  { %v2121_v63 = vadd.f32 %v3698_v3, %v2111_v58 }
 0x287   :  { %v2217_v48 = vunpack.c.l.b16 %v2184_v50 }
 0x288   :  { %vm2129_vm4 = vcmp.ge.f32.partialorder %v2121_v63, 0.0  ;;  %v2137_v4 = vmul.f32 0.01, %v2121_v63  ;;  %v1939_v7 = vpop.f32.mrf.mxu2 }
 0x289   :  { %v1940_v40 = vadd.f32 %v1939_v7, %v1806_v31 }
 0x28a   :  { %v2145_v39 = vsel %vm2129_vm4, %v2121_v63, %v2137_v4 }
 0x28b   :  { %v2101_v41 = vpop.f32.mrf.mxu3  ;;  %v2153_v42 = vadd.f32 %v3721_v25, %v2145_v39 }
 0x28c   :  { %v2112_v44 = vadd.f32 %v2101_v41, %v1940_v40 }
 0x28d   :  { %v2185_v45 = vpack.c.bf16 %v2153_v42, %v2153_v42 }
 0x28e   :  { %v2122_v46 = vadd.f32 %v3698_v3, %v2112_v44 }
 0x28f   :  { %v2218_v49 = vunpack.c.l.b16 %v2185_v45 }
 0x290   :  { %v2138_v51 = vmul.f32 0.01, %v2122_v46  ;;  %vm2130_vm6 = vcmp.ge.f32.partialorder %v2122_v46, 0.0  ;;  %v1941_v53 = vpop.f32.mrf.mxu2 }
 0x291   :  { %v2223_v54 = vpack.c.b16 %v2218_v49, %v2217_v48  ;;  %v1942_v55 = vadd.f32 %v1941_v53, %v1808_v52 }
 0x292   :  { %v2146_v62 = vsel %vm2130_vm6, %v2122_v46, %v2138_v51 }
 0x293   :  { %v2103_v61 = vpop.f32.mrf.mxu3  ;;  %2295 = vmatmul.bf16.gmra.mxu0 %v2223_v54  ;;  %v2154_v1 = vadd.f32 %v3726_v59, %v2146_v62 }
 0x294   :  { %v2113_v56 = vadd.f32 %v2103_v61, %v1942_v55 }
 0x295   :  { %v2186_v8 = vpack.c.bf16 %v2154_v1, %v2154_v1 }
 0x296   :  { %v2123_v0 = vadd.f32 %v3698_v3, %v2113_v56  ;;  %v2387_v3 = vpop.f32.mrf.mxu1 }
 0x297   :  { %v2219_v10 = vunpack.c.l.b16 %v2186_v8 }
 0x298   :  { %vm2131_vm7 = vcmp.ge.f32.partialorder %v2123_v0, 0.0  ;;  %v2139_v2 = vmul.f32 0.01, %v2123_v0 }
 0x29a   :  { %v2147_v5 = vsel %vm2131_vm7, %v2123_v0, %v2139_v2 }
 0x29b   :  { %v2155_v33 = vadd.f32 %v3729_v6, %v2147_v5 }
 0x29d   :  { %v2187_v9 = vpack.c.bf16 %v2155_v33, %v2155_v33 }
 0x29e   :  { %v2389_v12 = vpop.f32.mrf.mxu1 }
 0x29f   :  { %v2220_v11 = vunpack.c.l.b16 %v2187_v9 }
 0x2a1   :  { %v2224_v18 = vpack.c.b16 %v2220_v11, %v2219_v10 }
 0x2a3   :  { %2300 = vmatmul.bf16.gmra.mxu0 %v2224_v18 }
 0x2a6   :  { %v2392_v20 = vpop.f32.mrf.mxu1 }
 0x2ae   :  { %v2394_v43 = vpop.f32.mrf.mxu1 }
 0x2b6   :  { %v2397_v23 = vpop.f32.mrf.mxu1 }
 0x2be   :  { %v2399_v38 = vpop.f32.mrf.mxu1 }
 0x2c6   :  { %v2402_v41 = vpop.f32.mrf.mxu1 }
 0x2ce   :  { %v2404_v46 = vpop.f32.mrf.mxu1 }
 0x2f0   :  { %v2286_v15 = vpop.f32.mrf.mxu0 }
 0x2f1   :  { %v2388_v16 = vadd.f32 %v2387_v3, %v2286_v15 }
 0x2f3   :  { %v2423_v17 = vadd.f32 %v3211_v14, %v2388_v16 }
 0x2f5   :  { %v2431_v19 = vadd.f32 %v3702_v47, %v2423_v17 }
 0x2f7   :  { %2447 = vst [vmem:[#allocation10] sm:$0xff] %v2431_v19 }
 0x2f8   :  { %v2288_v24 = vpop.f32.mrf.mxu0 }
 0x2f9   :  { %v2390_v26 = vadd.f32 %v2389_v12, %v2288_v24 }
 0x2fb   :  { %v2424_v27 = vadd.f32 %v3211_v14, %v2390_v26 }
 0x2fd   :  { %v2432_v29 = vadd.f32 %v3705_v60, %v2424_v27  ;;  %v3213_v60 = vld [vmem:[%s3764_s0 + $0x2] ss:$0 sm:$0xff] }
 0x2ff   :  { %2448 = vst [vmem:[#allocation10 + $0x8] sm:$0xff] %v2432_v29 }
 0x300   :  { %v2291_v35 = vpop.f32.mrf.mxu0 }
 0x301   :  { %v2393_v30 = vadd.f32 %v2392_v20, %v2291_v35 }
 0x303   :  { %v2425_v37 = vadd.f32 %v3212_v34, %v2393_v30 }
 0x305   :  { %v2433_v36 = vadd.f32 %v3710_v13, %v2425_v37 }
 0x307   :  { %2449 = vst [vmem:[#allocation10 + $0x10] sm:$0xff] %v2433_v36 }
 0x308   :  { %v2293_v47 = vpop.f32.mrf.mxu0 }
 0x309   :  { %v2395_v22 = vadd.f32 %v2394_v43, %v2293_v47 }
 0x30b   :  { %v2426_v28 = vadd.f32 %v3212_v34, %v2395_v22 }
 0x30d   :  { %v2434_v57 = vadd.f32 %v3713_v21, %v2426_v28  ;;  %v3214_v21 = vld [vmem:[%s3764_s0 + $0x3] ss:$0 sm:$0xff] }
 0x30f   :  { %2450 = vst [vmem:[#allocation10 + $0x18] sm:$0xff] %v2434_v57 }
 0x310   :  { %v2296_v58 = vpop.f32.mrf.mxu0 }
 0x311   :  { %v2398_v63 = vadd.f32 %v2397_v23, %v2296_v58 }
 0x313   :  { %v2427_v31 = vadd.f32 %v3213_v60, %v2398_v63 }
 0x315   :  { %v2435_v4 = vadd.f32 %v3718_v32, %v2427_v31 }
 0x317   :  { %2451 = vst [vmem:[#allocation10 + $0x20] sm:$0xff] %v2435_v4 }
 0x318   :  { %v2298_v13 = vpop.f32.mrf.mxu0 }
 0x319   :  { %v2400_v7 = vadd.f32 %v2399_v38, %v2298_v13 }
 0x31b   :  { %v2428_v39 = vadd.f32 %v3213_v60, %v2400_v7 }
 0x31d   :  { %v2436_v40 = vadd.f32 %v3721_v25, %v2428_v39 }
 0x31f   :  { %2452 = vst [vmem:[#allocation10 + $0x28] sm:$0xff] %v2436_v40 }
 0x320   :  { %v2301_v42 = vpop.f32.mrf.mxu0 }
 0x321   :  { %v2403_v50 = vadd.f32 %v2402_v41, %v2301_v42 }
 0x323   :  { %v2429_v44 = vadd.f32 %v3214_v21, %v2403_v50 }
 0x325   :  { %v2437_v45 = vadd.f32 %v3726_v59, %v2429_v44 }
 0x327   :  { %2453 = vst [vmem:[#allocation10 + $0x30] sm:$0xff] %v2437_v45 }
 0x328   :  { %v2303_v32 = vpop.f32.mrf.mxu0 }
 0x329   :  { %v2405_v48 = vadd.f32 %v2404_v46, %v2303_v32 }
 0x32b   :  { %v2430_v25 = vadd.f32 %v3214_v21, %v2405_v48 }
 0x32d   :  { %v2438_v49 = vadd.f32 %v3729_v6, %v2430_v25 }
 0x32f   :  { %2454 = vst [vmem:[#allocation10 + $0x38] sm:$0xff] %v2438_v49 }
 0x330   :  { %2480 = dma.vmem_to_hbm [thread:$0]  %s2473_s20, 1024, %s2475_s23, [#allocation11], %s3360_s9, %s3360_s9, %s3361_s10  }
 0x331   :  { %3355 = dma.done.wait [#allocation5], 1024  }
 0x332   :  { %3356 = vsyncadd [#allocation5], 4294966272 }
 0x333   :  { %3357 = dma.done.wait [#allocation11], 1024  }
 0x334   :  { %3358 = vsyncadd [#allocation11], 4294966272 }
 0x335   :  { %2489 = vsyncpa [#allocation4], 1 }
 0x336   :  { %2490 = vsyncpa [#allocation7], 1 }
 0x337   :  { %2491 = vsyncpa [#allocation5], 1 }
 0x338   :  { %2492 = vsyncpa [#allocation11], 1 }

</bundles_post_ra>
